<compile_context>
chip_gen: v6e
topology: v6e:2x2x1
jax: 0.10.0
libtpu: 0.0.40
codegen_flags: <defaults>
</compile_context>

<pallas_src>
import functools

import numpy as np
import jax
import jax.numpy as jnp
from jax import lax
from jax.experimental import pallas as pl
from jax.experimental.pallas import tpu as pltpu

_EPS = 1e-5


def _dot(a, b):
  # Default MXU precision (bf16 operand passes), f32 accumulate.
  return jnp.dot(a, b, preferred_element_type=jnp.float32)


# ----------------------------------------------------------------------------
# Pallas kernel: upsample + concat + double_conv in one invocation.
# ----------------------------------------------------------------------------
def _up_kernel(x1_ref, x2_ref, rh_ref, rwc_ref,
               wa_ref, ba_ref, ga_ref, bta_ref,
               wb_ref, bb_ref, gb_ref, btb_ref,
               psum_ref, pscat_ref, out_ref, *, h, nh, inv_cnt, eps):
  # Bilinear 2x upsample (align_corners=True) of x1 as two small matmuls; rwc
  # also scatters x1's channels into the concat lane layout, and x2's x1-lanes
  # are zero, so channel-concat([x2, x1_up]) is a single add.
  x1u = _dot(_dot(rh_ref[...], x1_ref[...]), rwc_ref[...])
  xcat = x2_ref[...].astype(jnp.float32) + x1u                    # (nh, cin*W)

  # Hoisted dy = +/-1 row-validity masks: zero taps that would cross an
  # image's top/bottom edge or wrap into the neighbouring image / slab edge.
  hh = lax.broadcasted_iota(jnp.int32, (nh, 1), 0) % h
  valid_up = (hh >= 1).astype(jnp.float32)        # source row h-1 exists
  valid_dn = (hh <= h - 2).astype(jnp.float32)    # source row h+1 exists

  psum = psum_ref[...]      # (cout*W, cout) channel-sum operator
  pscat = pscat_ref[...]    # (cout, cout*W) channel-scatter operator

  def conv3x3_bn_relu(y, w_ref, b_ref, g_ref, bt_ref):
    # 3x3 conv as three accumulating MXU matmuls.  Row shifts via pltpu.roll
    # (XLU) + masks keep data in vregs -- no padded VMEM staging round-trip.
    # (roll follows jnp.roll semantics; shift = nh-1 is the -1 shift.)
    y_up = (pltpu.roll(y, 1, axis=0) * valid_up).astype(jnp.bfloat16)
    y_dn = (pltpu.roll(y, nh - 1, axis=0) * valid_dn).astype(jnp.bfloat16)
    conv = (_dot(y_up, w_ref[0]) + _dot(y.astype(jnp.bfloat16), w_ref[1])
            + _dot(y_dn, w_ref[2]) + b_ref[...])                  # (nh, cout*W) f32

    # BatchNorm2d (training-mode batch stats, biased var) + ReLU.
    # Reduce rows first (exact f32), then project to per-channel stats with
    # skinny operators; centered second moment avoids E[y^2]-E[y]^2 cancellation.
    mu_c = _dot(jnp.sum(conv, axis=0, keepdims=True), psum) * inv_cnt    # (1, cout)
    mu_l = _dot(mu_c, pscat)                                             # (1, cout*W)
    d = conv - mu_l
    var_c = _dot(jnp.sum(d * d, axis=0, keepdims=True), psum) * inv_cnt  # (1, cout)
    scale_l = _dot(g_ref[...] * lax.rsqrt(var_c + eps), pscat)           # (1, cout*W)
    return jnp.maximum(d * scale_l + bt_ref[...], 0.0)

  z = conv3x3_bn_relu(xcat, wa_ref, ba_ref, ga_ref, bta_ref)
  z = conv3x3_bn_relu(z, wb_ref, bb_ref, gb_ref, btb_ref)
  out_ref[...] = z.astype(out_ref.dtype)            # lane-dense (nh, cout*W)


# ----------------------------------------------------------------------------
# Host-side, shape-only constant builders (cached across calls).
# ----------------------------------------------------------------------------
def _interp_matrix(size_in, size_out):
  """Linear-interpolation matrix, PyTorch bilinear align_corners=True."""
  m = np.zeros((size_out, size_in), np.float32)
  if size_in == 1 or size_out == 1:
    m[:, 0] = 1.0
    return m
  scale = (size_in - 1) / (size_out - 1)
  for i in range(size_out):
    s = i * scale
    i0 = min(int(np.floor(s)), size_in - 1)
    f = s - i0
    i1 = min(i0 + 1, size_in - 1)
    m[i, i0] += 1.0 - f
    m[i, i1] += f
  return m


@functools.lru_cache(maxsize=None)
def _shape_consts(n, c1, c2, cout, h1, w1):
  h2, w2 = 2 * h1, 2 * w1
  cin = c1 + c2
  # Row upsample (block-diagonal over batch) and column upsample + channel
  # scatter into the concat lane layout.
  rh = np.kron(np.eye(n, dtype=np.float32), _interp_matrix(h1, h2))   # (n*h2, n*h1)
  rw_t = _interp_matrix(w1, w2).T                                     # (w1, w2)
  rwc = np.zeros((c1 * w1, cin * w2), np.float32)
  for c in range(c1):
    rwc[c * w1:(c + 1) * w1, (c2 + c) * w2:(c2 + c + 1) * w2] = rw_t
  # dx banding operator: band[kx, w_in, w_out] = 1 iff w_in == w_out + kx - 1.
  band = np.zeros((3, w2, w2), np.float32)
  for kx in range(3):
    for wo in range(w2):
      wi = wo + kx - 1
      if 0 <= wi < w2:
        band[kx, wi, wo] = 1.0
  # Skinny channel-sum / channel-scatter operators for BN stats.
  psum = np.kron(np.eye(cout, dtype=np.float32),
                 np.ones((w2, 1), np.float32))                        # (cout*w2, cout)
  pscat = np.ascontiguousarray(psum.T)                                # (cout, cout*w2)
  return rh, rwc, band, psum, pscat


def _full_spec(shape):
  nd = len(shape)
  return pl.BlockSpec(shape, lambda i: (0,) * nd)


# ----------------------------------------------------------------------------
# Public wrapper (NCHW in / NCHW out, like the PyTorch module).  Jitted so the
# constant prep is traced once per shape and baked as device constants.
# ----------------------------------------------------------------------------
@jax.jit
def up_pallas(x1_nchw, x2_nchw, params):
  n, c1, h1, w1 = x1_nchw.shape
  _, c2, h2x, w2x = x2_nchw.shape
  h2, w2 = 2 * h1, 2 * w1
  cin = c1 + c2
  cout = int(params["w3a"].shape[-1])
  nh = n * h2

  # F.pad(x2, (diffX//2, int(diffX/2), diffY//2, int(diffY/2))) -- faithful to
  # the module (W padded with the H-difference and vice versa); a no-op for
  # the standard matched power-of-2 sizes used here.
  dh = h2 - h2x   # "diffX"
  dw = w2 - w2x   # "diffY"
  x2p = jnp.pad(x2_nchw, ((0, 0), (0, 0), (dw // 2, dw // 2), (dh // 2, dh // 2)))
  assert x2p.shape[2] == h2 and x2p.shape[3] == w2, "spatial sizes must match after pad"

  rh_np, rwc_np, band_np, psum_np, pscat_np = _shape_consts(n, c1, c2, cout, h1, w1)
  band = jnp.asarray(band_np)

  # Lane-dense 2-D layout: rows = (n, h), lanes = (channel-major, w-minor).
  # bf16 operands for everything that hits the MXU; f32 accumulation in-kernel.
  x1_2d = jnp.transpose(x1_nchw, (0, 2, 1, 3)).reshape(n * h1, c1 * w1).astype(jnp.bfloat16)
  x2_2d = jnp.transpose(x2p, (0, 2, 1, 3)).reshape(nh, c2 * w2).astype(jnp.bfloat16)
  x2_emb = jnp.pad(x2_2d, ((0, 0), (0, (cin - c2) * w2)))   # x1_up's channel lanes stay zero

  def pack_w(w3):
    # HWIO (3,3,ci,co) -> three banded dy blocks of shape (ci*w2, co*w2).
    w3 = jnp.asarray(w3, jnp.float32)
    ci, co = w3.shape[2], w3.shape[3]
    wbig = jnp.einsum("ykio,kvw->yivow", w3, band)          # (3, ci, w2, co, w2)
    return wbig.reshape(3, ci * w2, co * w2).astype(jnp.bfloat16)

  def lanes(v):  # per-channel vector -> per-lane broadcast (1, c*w2), f32
    return jnp.repeat(jnp.asarray(v, jnp.float32), w2)[None, :]

  args = (
      x1_2d, x2_emb,
      jnp.asarray(rh_np, jnp.bfloat16), jnp.asarray(rwc_np, jnp.bfloat16),
      pack_w(params["w3a"]), lanes(params["b3a"]),
      jnp.asarray(params["ga"], jnp.float32)[None, :], lanes(params["bta"]),
      pack_w(params["w3b"]), lanes(params["b3b"]),
      jnp.asarray(params["gb"], jnp.float32)[None, :], lanes(params["btb"]),
      jnp.asarray(psum_np), jnp.asarray(pscat_np),
  )

  out2d = pl.pallas_call(
      functools.partial(_up_kernel, h=h2, nh=nh, inv_cnt=1.0 / (nh * w2), eps=_EPS),
      grid=(1,),
      in_specs=[_full_spec(a.shape) for a in args],
      out_specs=_full_spec((nh, cout * w2)),
      out_shape=jax.ShapeDtypeStruct((nh, cout * w2), jnp.float32),
      compiler_params=pltpu.CompilerParams(dimension_semantics=("arbitrary",)),
  )(*args)

  return jnp.transpose(out2d.reshape(n, h2, cout, w2), (0, 2, 1, 3))


# ----------------------------------------------------------------------------
# Pure-JAX golden reference (mirrors the PyTorch forward, strict f32).
# ----------------------------------------------------------------------------
def _upsample_bilinear_ac(x_nhwc, h2, w2):
  """Bilinear upsample with align_corners=True (independent gather+lerp impl)."""
  _, h1, w1, _ = x_nhwc.shape

  def coords(size_in, size_out):
    if size_in == 1 or size_out == 1:
      s = jnp.zeros((size_out,), jnp.float32)
    else:
      s = jnp.arange(size_out, dtype=jnp.float32) * ((size_in - 1) / (size_out - 1))
    i0 = jnp.clip(jnp.floor(s).astype(jnp.int32), 0, size_in - 1)
    i1 = jnp.clip(i0 + 1, 0, size_in - 1)
    return i0, i1, s - i0.astype(jnp.float32)

  y0, y1, fy = coords(h1, h2)
  x0, x1, fx = coords(w1, w2)
  top, bot = jnp.take(x_nhwc, y0, axis=1), jnp.take(x_nhwc, y1, axis=1)
  xh = top * (1.0 - fy)[None, :, None, None] + bot * fy[None, :, None, None]
  lft, rgt = jnp.take(xh, x0, axis=2), jnp.take(xh, x1, axis=2)
  return lft * (1.0 - fx)[None, None, :, None] + rgt * fx[None, None, :, None]


def up_ref(x1_nchw, x2_nchw, params):
  x1 = jnp.transpose(x1_nchw, (0, 2, 3, 1))
  x2 = jnp.transpose(x2_nchw, (0, 2, 3, 1))
  h2, w2 = 2 * x1.shape[1], 2 * x1.shape[2]
  x1u = _upsample_bilinear_ac(x1, h2, w2)
  dh = x1u.shape[1] - x2.shape[1]   # "diffX"
  dw = x1u.shape[2] - x2.shape[2]   # "diffY"
  x2 = jnp.pad(x2, ((0, 0), (dw // 2, dw // 2), (dh // 2, dh // 2), (0, 0)))
  x = jnp.concatenate([x2, x1u], axis=-1)

  def cbr(y, w3, b, g, bt):
    c = lax.conv_general_dilated(
        y, w3, window_strides=(1, 1), padding="SAME",
        dimension_numbers=("NHWC", "HWIO", "NHWC"),
        precision=lax.Precision.HIGHEST)
    c = c + b.reshape(1, 1, 1, -1)
    mu = jnp.mean(c, axis=(0, 1, 2), keepdims=True)
    var = jnp.mean(jnp.square(c - mu), axis=(0, 1, 2), keepdims=True)
    chat = (c - mu) * lax.rsqrt(var + _EPS)
    return jnp.maximum(chat * g.reshape(1, 1, 1, -1) + bt.reshape(1, 1, 1, -1), 0.0)

  z = cbr(x, params["w3a"], params["b3a"], params["ga"], params["bta"])
  z = cbr(z, params["w3b"], params["b3b"], params["gb"], params["btb"])
  return jnp.transpose(z, (0, 3, 1, 2))


def init_params(key, in_ch, out_ch):
  ks = jax.random.split(key, 8)
  f32 = jnp.float32
  return {
      "w3a": 0.25 * jax.random.normal(ks[0], (3, 3, in_ch, out_ch), f32),
      "b3a": 0.10 * jax.random.normal(ks[1], (out_ch,), f32),
      "ga":  1.0 + 0.1 * jax.random.normal(ks[2], (out_ch,), f32),
      "bta": 0.10 * jax.random.normal(ks[3], (out_ch,), f32),
      "w3b": 0.25 * jax.random.normal(ks[4], (3, 3, out_ch, out_ch), f32),
      "b3b": 0.10 * jax.random.normal(ks[5], (out_ch,), f32),
      "gb":  1.0 + 0.1 * jax.random.normal(ks[6], (out_ch,), f32),
      "btb": 0.10 * jax.random.normal(ks[7], (out_ch,), f32),
  }


if __name__ == "__main__":
  key = jax.random.PRNGKey(0)
  k1, k2, kp = jax.random.split(key, 3)
  n, c_half, h1, w1 = 2, 4, 8, 8                 # x1: deep feature, x2: skip connection
  in_ch, out_ch = 2 * c_half, 8

  x1 = jax.random.normal(k1, (n, c_half, h1, w1), jnp.float32)
  x2 = jax.random.normal(k2, (n, c_half, 2 * h1, 2 * w1), jnp.float32)
  params = init_params(kp, in_ch, out_ch)

  out = jax.block_until_ready(up_pallas(x1, x2, params))
  ref = jax.block_until_ready(up_ref(x1, x2, params))

  assert out.shape == (n, out_ch, 2 * h1, 2 * w1), out.shape
  # The kernel runs bf16-operand MXU matmuls (default precision) per the perf
  # guidance; the golden reference is strict f32, so the tolerance is sized
  # for bf16 rounding through two conv+BN layers.
  max_err = float(jnp.max(jnp.abs(out - ref)))
  if not np.allclose(np.asarray(out), np.asarray(ref), rtol=2e-2, atol=5e-2):
    raise AssertionError(f"Pallas output mismatch vs reference (max abs err={max_err})")
  print("KERNEL_OK")
</pallas_src>

<mosaic_0001>
module attributes {stable_mosaic.version = 11 : i64} {
  func.func @_up_kernel(%arg0: i32, %arg1: memref<16x32xbf16, #tpu.memory_space<vmem>>, %arg2: memref<32x128xbf16, #tpu.memory_space<vmem>>, %arg3: memref<32x16xbf16, #tpu.memory_space<vmem>>, %arg4: memref<32x128xbf16, #tpu.memory_space<vmem>>, %arg5: memref<3x128x128xbf16, #tpu.memory_space<vmem>>, %arg6: memref<1x128xf32, #tpu.memory_space<vmem>>, %arg7: memref<1x8xf32, #tpu.memory_space<vmem>>, %arg8: memref<1x128xf32, #tpu.memory_space<vmem>>, %arg9: memref<3x128x128xbf16, #tpu.memory_space<vmem>>, %arg10: memref<1x128xf32, #tpu.memory_space<vmem>>, %arg11: memref<1x8xf32, #tpu.memory_space<vmem>>, %arg12: memref<1x128xf32, #tpu.memory_space<vmem>>, %arg13: memref<128x8xf32, #tpu.memory_space<vmem>>, %arg14: memref<8x128xf32, #tpu.memory_space<vmem>>, %arg15: memref<32x128xf32, #tpu.memory_space<vmem>>) attributes {dimension_semantics = [#tpu.dimension_semantics<arbitrary>], iteration_bounds = array<i64: 1>, scalar_prefetch = 0 : i64, scratch_operands = 0 : i64, tpu.core_type = #tpu.core_type<tc>, window_params = [{pipeline_mode = #tpu.pipeline_mode<synchronous>, transform_indices = @transform_0, window_bounds = array<i64: 16, 32>}, {pipeline_mode = #tpu.pipeline_mode<synchronous>, transform_indices = @transform_1, window_bounds = array<i64: 32, 128>}, {pipeline_mode = #tpu.pipeline_mode<synchronous>, transform_indices = @transform_2, window_bounds = array<i64: 32, 16>}, {pipeline_mode = #tpu.pipeline_mode<synchronous>, transform_indices = @transform_3, window_bounds = array<i64: 32, 128>}, {pipeline_mode = #tpu.pipeline_mode<synchronous>, transform_indices = @transform_4, window_bounds = array<i64: 3, 128, 128>}, {pipeline_mode = #tpu.pipeline_mode<synchronous>, transform_indices = @transform_5, window_bounds = array<i64: 1, 128>}, {pipeline_mode = #tpu.pipeline_mode<synchronous>, transform_indices = @transform_6, window_bounds = array<i64: 1, 8>}, {pipeline_mode = #tpu.pipeline_mode<synchronous>, transform_indices = @transform_7, window_bounds = array<i64: 1, 128>}, {pipeline_mode = #tpu.pipeline_mode<synchronous>, transform_indices = @transform_8, window_bounds = array<i64: 3, 128, 128>}, {pipeline_mode = #tpu.pipeline_mode<synchronous>, transform_indices = @transform_9, window_bounds = array<i64: 1, 128>}, {pipeline_mode = #tpu.pipeline_mode<synchronous>, transform_indices = @transform_10, window_bounds = array<i64: 1, 8>}, {pipeline_mode = #tpu.pipeline_mode<synchronous>, transform_indices = @transform_11, window_bounds = array<i64: 1, 128>}, {pipeline_mode = #tpu.pipeline_mode<synchronous>, transform_indices = @transform_12, window_bounds = array<i64: 128, 8>}, {pipeline_mode = #tpu.pipeline_mode<synchronous>, transform_indices = @transform_13, window_bounds = array<i64: 8, 128>}, {pipeline_mode = #tpu.pipeline_mode<synchronous>, transform_indices = @transform_14, window_bounds = array<i64: 32, 128>}]} {
    %c0 = arith.constant 0 : index
    %c0_0 = arith.constant 0 : index
    %0 = vector.load %arg3[%c0, %c0_0] : memref<32x16xbf16, #tpu.memory_space<vmem>>, vector<32x16xbf16>
    %c0_1 = arith.constant 0 : index
    %c0_2 = arith.constant 0 : index
    %1 = vector.load %arg1[%c0_1, %c0_2] : memref<16x32xbf16, #tpu.memory_space<vmem>>, vector<16x32xbf16>
    %cst = arith.constant dense<0.000000e+00> : vector<32x32xf32>
    %2 = tpu.matmul %0, %1, %cst {dimension_numbers = #tpu.dot_dimension_numbers<[1], [0], [0], [1], [0, 0, 1, 1], [], []>} : vector<32x16xbf16>, vector<16x32xbf16>, vector<32x32xf32> -> vector<32x32xf32>
    %c0_3 = arith.constant 0 : index
    %c0_4 = arith.constant 0 : index
    %3 = vector.load %arg4[%c0_3, %c0_4] : memref<32x128xbf16, #tpu.memory_space<vmem>>, vector<32x128xbf16>
    %cst_5 = arith.constant dense<0.000000e+00> : vector<32x128xf32>
    %4 = tpu.matmul %2, %3, %cst_5 {dimension_numbers = #tpu.dot_dimension_numbers<[1], [0], [0], [1], [0, 0, 1, 1], [], []>} : vector<32x32xf32>, vector<32x128xbf16>, vector<32x128xf32> -> vector<32x128xf32>
    %c0_6 = arith.constant 0 : index
    %c0_7 = arith.constant 0 : index
    %5 = vector.load %arg2[%c0_6, %c0_7] : memref<32x128xbf16, #tpu.memory_space<vmem>>, vector<32x128xbf16>
    %6 = arith.extf %5 : vector<32x128xbf16> to vector<32x128xf32>
    %7 = arith.addf %6, %4 : vector<32x128xf32>
    %8 = tpu.iota {dimensions = array<i32: 0>} : vector<32x1xi32>
    %c16_i32 = arith.constant 16 : i32
    %c0_i32 = arith.constant 0 : i32
    %9 = arith.cmpi eq, %c16_i32, %c0_i32 : i32
    %c1_i32 = arith.constant 1 : i32
    %10 = arith.select %9, %c1_i32, %c16_i32 : i32
    %11 = vector.broadcast %10 : i32 to vector<32x1xi32>
    %12 = arith.remsi %8, %11 : vector<32x1xi32>
    %c0_i32_8 = arith.constant 0 : i32
    %13 = vector.broadcast %c0_i32_8 : i32 to vector<32x1xi32>
    %14 = arith.cmpi ne, %12, %13 : vector<32x1xi32>
    %c0_i32_9 = arith.constant 0 : i32
    %15 = vector.broadcast %c0_i32_9 : i32 to vector<32x1xi32>
    %16 = arith.cmpi slt, %12, %15 : vector<32x1xi32>
    %c0_i32_10 = arith.constant 0 : i32
    %17 = arith.cmpi slt, %10, %c0_i32_10 : i32
    %18 = vector.broadcast %17 : i1 to vector<32x1xi1>
    %19 = vector.broadcast %18 : vector<32x1xi1> to vector<32x1xi1>
    %20 = arith.xori %16, %19 : vector<32x1xi1>
    %21 = arith.andi %20, %14 : vector<32x1xi1>
    %22 = vector.broadcast %10 : i32 to vector<32x1xi32>
    %23 = arith.addi %12, %22 : vector<32x1xi32>
    %24 = arith.select %21, %23, %12 : vector<32x1xi1>, vector<32x1xi32>
    %c1_i32_11 = arith.constant 1 : i32
    %25 = vector.broadcast %c1_i32_11 : i32 to vector<32x1xi32>
    %26 = arith.cmpi sge, %24, %25 : vector<32x1xi32>
    %27 = arith.extui %26 : vector<32x1xi1> to vector<32x1xi32>
    %28 = arith.sitofp %27 : vector<32x1xi32> to vector<32x1xf32>
    %c14_i32 = arith.constant 14 : i32
    %29 = vector.broadcast %c14_i32 : i32 to vector<32x1xi32>
    %30 = arith.cmpi sle, %24, %29 : vector<32x1xi32>
    %31 = arith.extui %30 : vector<32x1xi1> to vector<32x1xi32>
    %32 = arith.sitofp %31 : vector<32x1xi32> to vector<32x1xf32>
    %c0_12 = arith.constant 0 : index
    %c0_13 = arith.constant 0 : index
    %33 = vector.load %arg13[%c0_12, %c0_13] : memref<128x8xf32, #tpu.memory_space<vmem>>, vector<128x8xf32>
    %c0_14 = arith.constant 0 : index
    %c0_15 = arith.constant 0 : index
    %34 = vector.load %arg14[%c0_14, %c0_15] : memref<8x128xf32, #tpu.memory_space<vmem>>, vector<8x128xf32>
    %c1_i32_16 = arith.constant 1 : i32
    %35 = tpu.dynamic_rotate %7 by %c1_i32_16 dim 0 : vector<32x128xf32>, i32 -> vector<32x128xf32>
    %36 = vector.broadcast %28 : vector<32x1xf32> to vector<32x128xf32>
    %37 = arith.mulf %35, %36 : vector<32x128xf32>
    %38 = arith.truncf %37 : vector<32x128xf32> to vector<32x128xbf16>
    %c31_i32 = arith.constant 31 : i32
    %39 = tpu.dynamic_rotate %7 by %c31_i32 dim 0 : vector<32x128xf32>, i32 -> vector<32x128xf32>
    %40 = vector.broadcast %32 : vector<32x1xf32> to vector<32x128xf32>
    %41 = arith.mulf %39, %40 : vector<32x128xf32>
    %42 = arith.truncf %41 : vector<32x128xf32> to vector<32x128xbf16>
    %c0_17 = arith.constant 0 : index
    %c0_18 = arith.constant 0 : index
    %c0_19 = arith.constant 0 : index
    %43 = vector.load %arg5[%c0_17, %c0_18, %c0_19] : memref<3x128x128xbf16, #tpu.memory_space<vmem>>, vector<1x128x128xbf16>
    %44 = vector.shape_cast %43 : vector<1x128x128xbf16> to vector<128x128xbf16>
    %cst_20 = arith.constant dense<0.000000e+00> : vector<32x128xf32>
    %45 = tpu.matmul %38, %44, %cst_20 {dimension_numbers = #tpu.dot_dimension_numbers<[1], [0], [0], [1], [0, 0, 1, 1], [], []>} : vector<32x128xbf16>, vector<128x128xbf16>, vector<32x128xf32> -> vector<32x128xf32>
    %46 = arith.truncf %7 : vector<32x128xf32> to vector<32x128xbf16>
    %c1 = arith.constant 1 : index
    %c0_21 = arith.constant 0 : index
    %c0_22 = arith.constant 0 : index
    %47 = vector.load %arg5[%c1, %c0_21, %c0_22] : memref<3x128x128xbf16, #tpu.memory_space<vmem>>, vector<1x128x128xbf16>
    %48 = vector.shape_cast %47 : vector<1x128x128xbf16> to vector<128x128xbf16>
    %cst_23 = arith.constant dense<0.000000e+00> : vector<32x128xf32>
    %49 = tpu.matmul %46, %48, %cst_23 {dimension_numbers = #tpu.dot_dimension_numbers<[1], [0], [0], [1], [0, 0, 1, 1], [], []>} : vector<32x128xbf16>, vector<128x128xbf16>, vector<32x128xf32> -> vector<32x128xf32>
    %50 = arith.addf %45, %49 : vector<32x128xf32>
    %c2 = arith.constant 2 : index
    %c0_24 = arith.constant 0 : index
    %c0_25 = arith.constant 0 : index
    %51 = vector.load %arg5[%c2, %c0_24, %c0_25] : memref<3x128x128xbf16, #tpu.memory_space<vmem>>, vector<1x128x128xbf16>
    %52 = vector.shape_cast %51 : vector<1x128x128xbf16> to vector<128x128xbf16>
    %cst_26 = arith.constant dense<0.000000e+00> : vector<32x128xf32>
    %53 = tpu.matmul %42, %52, %cst_26 {dimension_numbers = #tpu.dot_dimension_numbers<[1], [0], [0], [1], [0, 0, 1, 1], [], []>} : vector<32x128xbf16>, vector<128x128xbf16>, vector<32x128xf32> -> vector<32x128xf32>
    %54 = arith.addf %50, %53 : vector<32x128xf32>
    %c0_27 = arith.constant 0 : index
    %c0_28 = arith.constant 0 : index
    %55 = vector.load %arg6[%c0_27, %c0_28] : memref<1x128xf32, #tpu.memory_space<vmem>>, vector<1x128xf32>
    %56 = vector.broadcast %55 : vector<1x128xf32> to vector<32x128xf32>
    %57 = arith.addf %54, %56 : vector<32x128xf32>
    %cst_29 = arith.constant dense<0.000000e+00> : vector<128xf32>
    %58 = vector.multi_reduction <add>, %57, %cst_29 [0] : vector<32x128xf32> to vector<128xf32>
    %59 = vector.shape_cast %58 : vector<128xf32> to vector<1x128xf32>
    %cst_30 = arith.constant dense<0.000000e+00> : vector<1x8xf32>
    %60 = tpu.matmul %59, %33, %cst_30 {dimension_numbers = #tpu.dot_dimension_numbers<[1], [0], [0], [1], [0, 0, 1, 1], [], []>} : vector<1x128xf32>, vector<128x8xf32>, vector<1x8xf32> -> vector<1x8xf32>
    %cst_31 = arith.constant 0.001953125 : f32
    %61 = vector.broadcast %cst_31 : f32 to vector<1x8xf32>
    %62 = arith.mulf %60, %61 : vector<1x8xf32>
    %cst_32 = arith.constant dense<0.000000e+00> : vector<1x128xf32>
    %63 = tpu.matmul %62, %34, %cst_32 {dimension_numbers = #tpu.dot_dimension_numbers<[1], [0], [0], [1], [0, 0, 1, 1], [], []>} : vector<1x8xf32>, vector<8x128xf32>, vector<1x128xf32> -> vector<1x128xf32>
    %64 = vector.broadcast %63 : vector<1x128xf32> to vector<32x128xf32>
    %65 = arith.subf %57, %64 : vector<32x128xf32>
    %66 = arith.mulf %65, %65 : vector<32x128xf32>
    %cst_33 = arith.constant dense<0.000000e+00> : vector<128xf32>
    %67 = vector.multi_reduction <add>, %66, %cst_33 [0] : vector<32x128xf32> to vector<128xf32>
    %68 = vector.shape_cast %67 : vector<128xf32> to vector<1x128xf32>
    %cst_34 = arith.constant dense<0.000000e+00> : vector<1x8xf32>
    %69 = tpu.matmul %68, %33, %cst_34 {dimension_numbers = #tpu.dot_dimension_numbers<[1], [0], [0], [1], [0, 0, 1, 1], [], []>} : vector<1x128xf32>, vector<128x8xf32>, vector<1x8xf32> -> vector<1x8xf32>
    %cst_35 = arith.constant 0.001953125 : f32
    %70 = vector.broadcast %cst_35 : f32 to vector<1x8xf32>
    %71 = arith.mulf %69, %70 : vector<1x8xf32>
    %c0_36 = arith.constant 0 : index
    %c0_37 = arith.constant 0 : index
    %72 = vector.load %arg7[%c0_36, %c0_37] : memref<1x8xf32, #tpu.memory_space<vmem>>, vector<1x8xf32>
    %cst_38 = arith.constant 9.99999974E-6 : f32
    %73 = vector.broadcast %cst_38 : f32 to vector<1x8xf32>
    %74 = arith.addf %71, %73 : vector<1x8xf32>
    %75 = math.rsqrt %74 : vector<1x8xf32>
    %76 = arith.mulf %72, %75 : vector<1x8xf32>
    %cst_39 = arith.constant dense<0.000000e+00> : vector<1x128xf32>
    %77 = tpu.matmul %76, %34, %cst_39 {dimension_numbers = #tpu.dot_dimension_numbers<[1], [0], [0], [1], [0, 0, 1, 1], [], []>} : vector<1x8xf32>, vector<8x128xf32>, vector<1x128xf32> -> vector<1x128xf32>
    %78 = vector.broadcast %77 : vector<1x128xf32> to vector<32x128xf32>
    %79 = arith.mulf %65, %78 : vector<32x128xf32>
    %c0_40 = arith.constant 0 : index
    %c0_41 = arith.constant 0 : index
    %80 = vector.load %arg8[%c0_40, %c0_41] : memref<1x128xf32, #tpu.memory_space<vmem>>, vector<1x128xf32>
    %81 = vector.broadcast %80 : vector<1x128xf32> to vector<32x128xf32>
    %82 = arith.addf %79, %81 : vector<32x128xf32>
    %cst_42 = arith.constant 0.000000e+00 : f32
    %83 = vector.broadcast %cst_42 : f32 to vector<32x128xf32>
    %84 = arith.maximumf %82, %83 : vector<32x128xf32>
    %c1_i32_43 = arith.constant 1 : i32
    %85 = tpu.dynamic_rotate %84 by %c1_i32_43 dim 0 : vector<32x128xf32>, i32 -> vector<32x128xf32>
    %86 = vector.broadcast %28 : vector<32x1xf32> to vector<32x128xf32>
    %87 = arith.mulf %85, %86 : vector<32x128xf32>
    %88 = arith.truncf %87 : vector<32x128xf32> to vector<32x128xbf16>
    %c31_i32_44 = arith.constant 31 : i32
    %89 = tpu.dynamic_rotate %84 by %c31_i32_44 dim 0 : vector<32x128xf32>, i32 -> vector<32x128xf32>
    %90 = vector.broadcast %32 : vector<32x1xf32> to vector<32x128xf32>
    %91 = arith.mulf %89, %90 : vector<32x128xf32>
    %92 = arith.truncf %91 : vector<32x128xf32> to vector<32x128xbf16>
    %c0_45 = arith.constant 0 : index
    %c0_46 = arith.constant 0 : index
    %c0_47 = arith.constant 0 : index
    %93 = vector.load %arg9[%c0_45, %c0_46, %c0_47] : memref<3x128x128xbf16, #tpu.memory_space<vmem>>, vector<1x128x128xbf16>
    %94 = vector.shape_cast %93 : vector<1x128x128xbf16> to vector<128x128xbf16>
    %cst_48 = arith.constant dense<0.000000e+00> : vector<32x128xf32>
    %95 = tpu.matmul %88, %94, %cst_48 {dimension_numbers = #tpu.dot_dimension_numbers<[1], [0], [0], [1], [0, 0, 1, 1], [], []>} : vector<32x128xbf16>, vector<128x128xbf16>, vector<32x128xf32> -> vector<32x128xf32>
    %96 = arith.truncf %84 : vector<32x128xf32> to vector<32x128xbf16>
    %c1_49 = arith.constant 1 : index
    %c0_50 = arith.constant 0 : index
    %c0_51 = arith.constant 0 : index
    %97 = vector.load %arg9[%c1_49, %c0_50, %c0_51] : memref<3x128x128xbf16, #tpu.memory_space<vmem>>, vector<1x128x128xbf16>
    %98 = vector.shape_cast %97 : vector<1x128x128xbf16> to vector<128x128xbf16>
    %cst_52 = arith.constant dense<0.000000e+00> : vector<32x128xf32>
    %99 = tpu.matmul %96, %98, %cst_52 {dimension_numbers = #tpu.dot_dimension_numbers<[1], [0], [0], [1], [0, 0, 1, 1], [], []>} : vector<32x128xbf16>, vector<128x128xbf16>, vector<32x128xf32> -> vector<32x128xf32>
    %100 = arith.addf %95, %99 : vector<32x128xf32>
    %c2_53 = arith.constant 2 : index
    %c0_54 = arith.constant 0 : index
    %c0_55 = arith.constant 0 : index
    %101 = vector.load %arg9[%c2_53, %c0_54, %c0_55] : memref<3x128x128xbf16, #tpu.memory_space<vmem>>, vector<1x128x128xbf16>
    %102 = vector.shape_cast %101 : vector<1x128x128xbf16> to vector<128x128xbf16>
    %cst_56 = arith.constant dense<0.000000e+00> : vector<32x128xf32>
    %103 = tpu.matmul %92, %102, %cst_56 {dimension_numbers = #tpu.dot_dimension_numbers<[1], [0], [0], [1], [0, 0, 1, 1], [], []>} : vector<32x128xbf16>, vector<128x128xbf16>, vector<32x128xf32> -> vector<32x128xf32>
    %104 = arith.addf %100, %103 : vector<32x128xf32>
    %c0_57 = arith.constant 0 : index
    %c0_58 = arith.constant 0 : index
    %105 = vector.load %arg10[%c0_57, %c0_58] : memref<1x128xf32, #tpu.memory_space<vmem>>, vector<1x128xf32>
    %106 = vector.broadcast %105 : vector<1x128xf32> to vector<32x128xf32>
    %107 = arith.addf %104, %106 : vector<32x128xf32>
    %cst_59 = arith.constant dense<0.000000e+00> : vector<128xf32>
    %108 = vector.multi_reduction <add>, %107, %cst_59 [0] : vector<32x128xf32> to vector<128xf32>
    %109 = vector.shape_cast %108 : vector<128xf32> to vector<1x128xf32>
    %cst_60 = arith.constant dense<0.000000e+00> : vector<1x8xf32>
    %110 = tpu.matmul %109, %33, %cst_60 {dimension_numbers = #tpu.dot_dimension_numbers<[1], [0], [0], [1], [0, 0, 1, 1], [], []>} : vector<1x128xf32>, vector<128x8xf32>, vector<1x8xf32> -> vector<1x8xf32>
    %cst_61 = arith.constant 0.001953125 : f32
    %111 = vector.broadcast %cst_61 : f32 to vector<1x8xf32>
    %112 = arith.mulf %110, %111 : vector<1x8xf32>
    %cst_62 = arith.constant dense<0.000000e+00> : vector<1x128xf32>
    %113 = tpu.matmul %112, %34, %cst_62 {dimension_numbers = #tpu.dot_dimension_numbers<[1], [0], [0], [1], [0, 0, 1, 1], [], []>} : vector<1x8xf32>, vector<8x128xf32>, vector<1x128xf32> -> vector<1x128xf32>
    %114 = vector.broadcast %113 : vector<1x128xf32> to vector<32x128xf32>
    %115 = arith.subf %107, %114 : vector<32x128xf32>
    %116 = arith.mulf %115, %115 : vector<32x128xf32>
    %cst_63 = arith.constant dense<0.000000e+00> : vector<128xf32>
    %117 = vector.multi_reduction <add>, %116, %cst_63 [0] : vector<32x128xf32> to vector<128xf32>
    %118 = vector.shape_cast %117 : vector<128xf32> to vector<1x128xf32>
    %cst_64 = arith.constant dense<0.000000e+00> : vector<1x8xf32>
    %119 = tpu.matmul %118, %33, %cst_64 {dimension_numbers = #tpu.dot_dimension_numbers<[1], [0], [0], [1], [0, 0, 1, 1], [], []>} : vector<1x128xf32>, vector<128x8xf32>, vector<1x8xf32> -> vector<1x8xf32>
    %cst_65 = arith.constant 0.001953125 : f32
    %120 = vector.broadcast %cst_65 : f32 to vector<1x8xf32>
    %121 = arith.mulf %119, %120 : vector<1x8xf32>
    %c0_66 = arith.constant 0 : index
    %c0_67 = arith.constant 0 : index
    %122 = vector.load %arg11[%c0_66, %c0_67] : memref<1x8xf32, #tpu.memory_space<vmem>>, vector<1x8xf32>
    %cst_68 = arith.constant 9.99999974E-6 : f32
    %123 = vector.broadcast %cst_68 : f32 to vector<1x8xf32>
    %124 = arith.addf %121, %123 : vector<1x8xf32>
    %125 = math.rsqrt %124 : vector<1x8xf32>
    %126 = arith.mulf %122, %125 : vector<1x8xf32>
    %cst_69 = arith.constant dense<0.000000e+00> : vector<1x128xf32>
    %127 = tpu.matmul %126, %34, %cst_69 {dimension_numbers = #tpu.dot_dimension_numbers<[1], [0], [0], [1], [0, 0, 1, 1], [], []>} : vector<1x8xf32>, vector<8x128xf32>, vector<1x128xf32> -> vector<1x128xf32>
    %128 = vector.broadcast %127 : vector<1x128xf32> to vector<32x128xf32>
    %129 = arith.mulf %115, %128 : vector<32x128xf32>
    %c0_70 = arith.constant 0 : index
    %c0_71 = arith.constant 0 : index
    %130 = vector.load %arg12[%c0_70, %c0_71] : memref<1x128xf32, #tpu.memory_space<vmem>>, vector<1x128xf32>
    %131 = vector.broadcast %130 : vector<1x128xf32> to vector<32x128xf32>
    %132 = arith.addf %129, %131 : vector<32x128xf32>
    %cst_72 = arith.constant 0.000000e+00 : f32
    %133 = vector.broadcast %cst_72 : f32 to vector<32x128xf32>
    %134 = arith.maximumf %132, %133 : vector<32x128xf32>
    %c0_73 = arith.constant 0 : index
    %c0_74 = arith.constant 0 : index
    %135 = vector.load %arg15[%c0_73, %c0_74] : memref<32x128xf32, #tpu.memory_space<vmem>>, vector<32x128xf32>
    tpu.vector_store %arg15[%c0_73, %c0_74], %134 {strides = array<i32>} : memref<32x128xf32, #tpu.memory_space<vmem>>, vector<32x128xf32>,
    return
  }
  func.func @transform_0(%arg0: i32) -> (i32, i32) {
    %c0_i32 = arith.constant 0 : i32
    %c0_i32_0 = arith.constant 0 : i32
    %c0_i32_1 = arith.constant 0 : i32
    return %c0_i32, %c0_i32_0 : i32, i32
  }
  func.func @transform_1(%arg0: i32) -> (i32, i32) {
    %c0_i32 = arith.constant 0 : i32
    %c0_i32_0 = arith.constant 0 : i32
    %c0_i32_1 = arith.constant 0 : i32
    return %c0_i32, %c0_i32_0 : i32, i32
  }
  func.func @transform_2(%arg0: i32) -> (i32, i32) {
    %c0_i32 = arith.constant 0 : i32
    %c0_i32_0 = arith.constant 0 : i32
    %c0_i32_1 = arith.constant 0 : i32
    return %c0_i32, %c0_i32_0 : i32, i32
  }
  func.func @transform_3(%arg0: i32) -> (i32, i32) {
    %c0_i32 = arith.constant 0 : i32
    %c0_i32_0 = arith.constant 0 : i32
    %c0_i32_1 = arith.constant 0 : i32
    return %c0_i32, %c0_i32_0 : i32, i32
  }
  func.func @transform_4(%arg0: i32) -> (i32, i32, i32) {
    %c0_i32 = arith.constant 0 : i32
    %c0_i32_0 = arith.constant 0 : i32
    %c0_i32_1 = arith.constant 0 : i32
    %c0_i32_2 = arith.constant 0 : i32
    return %c0_i32, %c0_i32_0, %c0_i32_1 : i32, i32, i32
  }
  func.func @transform_5(%arg0: i32) -> (i32, i32) {
    %c0_i32 = arith.constant 0 : i32
    %c0_i32_0 = arith.constant 0 : i32
    %c0_i32_1 = arith.constant 0 : i32
    return %c0_i32, %c0_i32_0 : i32, i32
  }
  func.func @transform_6(%arg0: i32) -> (i32, i32) {
    %c0_i32 = arith.constant 0 : i32
    %c0_i32_0 = arith.constant 0 : i32
    %c0_i32_1 = arith.constant 0 : i32
    return %c0_i32, %c0_i32_0 : i32, i32
  }
  func.func @transform_7(%arg0: i32) -> (i32, i32) {
    %c0_i32 = arith.constant 0 : i32
    %c0_i32_0 = arith.constant 0 : i32
    %c0_i32_1 = arith.constant 0 : i32
    return %c0_i32, %c0_i32_0 : i32, i32
  }
  func.func @transform_8(%arg0: i32) -> (i32, i32, i32) {
    %c0_i32 = arith.constant 0 : i32
    %c0_i32_0 = arith.constant 0 : i32
    %c0_i32_1 = arith.constant 0 : i32
    %c0_i32_2 = arith.constant 0 : i32
    return %c0_i32, %c0_i32_0, %c0_i32_1 : i32, i32, i32
  }
  func.func @transform_9(%arg0: i32) -> (i32, i32) {
    %c0_i32 = arith.constant 0 : i32
    %c0_i32_0 = arith.constant 0 : i32
    %c0_i32_1 = arith.constant 0 : i32
    return %c0_i32, %c0_i32_0 : i32, i32
  }
  func.func @transform_10(%arg0: i32) -> (i32, i32) {
    %c0_i32 = arith.constant 0 : i32
    %c0_i32_0 = arith.constant 0 : i32
    %c0_i32_1 = arith.constant 0 : i32
    return %c0_i32, %c0_i32_0 : i32, i32
  }
  func.func @transform_11(%arg0: i32) -> (i32, i32) {
    %c0_i32 = arith.constant 0 : i32
    %c0_i32_0 = arith.constant 0 : i32
    %c0_i32_1 = arith.constant 0 : i32
    return %c0_i32, %c0_i32_0 : i32, i32
  }
  func.func @transform_12(%arg0: i32) -> (i32, i32) {
    %c0_i32 = arith.constant 0 : i32
    %c0_i32_0 = arith.constant 0 : i32
    %c0_i32_1 = arith.constant 0 : i32
    return %c0_i32, %c0_i32_0 : i32, i32
  }
  func.func @transform_13(%arg0: i32) -> (i32, i32) {
    %c0_i32 = arith.constant 0 : i32
    %c0_i32_0 = arith.constant 0 : i32
    %c0_i32_1 = arith.constant 0 : i32
    return %c0_i32, %c0_i32_0 : i32, i32
  }
  func.func @transform_14(%arg0: i32) -> (i32, i32) {
    %c0_i32 = arith.constant 0 : i32
    %c0_i32_0 = arith.constant 0 : i32
    %c0_i32_1 = arith.constant 0 : i32
    return %c0_i32, %c0_i32_0 : i32, i32
  }
}

</mosaic_0001>

<bundles_post_ra>
// kernel: up_pallas.1
= control target key start
LH: loop header
LB: loop body
LE: loop exit
PB: predicated region body
PF: predicated region fallthrough
CT: control target
= control target key end

     0   :  { %vm70_vm0 = vcmask 130048   ;;  %vm142_vm1 = vcmask 261120   ;;  %v2431_v26 = vmov 0.0   ;;  %v220_v27 = vlaneseq  ;;  %s3060_s0 = inlined_call_operand.vmem [shape: bf16[16,32], index: 0, kind: input, shape index: {}]   ;;  %s3061_s2 = inlined_call_operand.vmem [shape: bf16[32,16], index: 2, kind: input, shape index: {}]   ;;  %s3062_s3 = inlined_call_operand.vmem [shape: bf16[32,128], index: 3, kind: input, shape index: {}]   ;;  %s3063_s4 = inlined_call_operand.vmem [shape: bf16[3,128,128], index: 4, kind: input, shape index: {}]   ;;  %s3064_s1 = inlined_call_operand.vmem [shape: bf16[32,128], index: 1, kind: input, shape index: {}]   ;;  %s3065_s12 = inlined_call_operand.vmem [shape: f32[128,8], index: 12, kind: input, shape index: {}]   ;;  %s3066_s13 = inlined_call_operand.vmem [shape: f32[8,128], index: 13, kind: input, shape index: {}]   ;;  %s3067_s5 = inlined_call_operand.vmem [shape: f32[1,128], index: 5, kind: input, shape index: {}]   ;;  %s3068_s8 = inlined_call_operand.vmem [shape: bf16[3,128,128], index: 8, kind: input, shape index: {}]   ;;  %s3069_s6 = inlined_call_operand.vmem [shape: f32[1,8], index: 6, kind: input, shape index: {}]   ;;  %s3070_s7 = inlined_call_operand.vmem [shape: f32[1,128], index: 7, kind: input, shape index: {}]   ;;  %s3071_s9 = inlined_call_operand.vmem [shape: f32[1,128], index: 9, kind: input, shape index: {}]   ;;  %s3072_s10 = inlined_call_operand.vmem [shape: f32[1,8], index: 10, kind: input, shape index: {}]   ;;  %s3073_s11 = inlined_call_operand.vmem [shape: f32[1,128], index: 11, kind: input, shape index: {}]   ;;  %s3074_s14 = inlined_call_operand.vmem [shape: f32[32,128], index: 14, kind: output, shape index: {}]  }
   0x1   :  { %v2374_v0 = vld [vmem:[%s3060_s0] sm:$0xff]   ;;  %v2376_v2 = vld [vmem:[%s3061_s2 + $0x8] sm:$0xff]   ;;  %v2379_v5 = vld [vmem:[%s3063_s4 + $0x78] sm:$0xff]   ;;  %vm2432_vm8 = vmmov 0   ;;  %vm782_vm9 = vcmask 64512  }
   0x2   :  { %v2375_v1 = vld [vmem:[%s3061_s2] sm:$0xff]   ;;  %2076 = vmatprep.subr.bf16.mxu0 %v2374_v0  ;;  %v2377_v3 = vld [vmem:[%s3062_s3 + $0x8] sm:$0xff]   ;;  %v2380_v6 = vld [vmem:[%s3063_s4 + $0x70] sm:$0xff]   ;;  %v2575_v28 = vshrl.u32 %v220_v27, 7 }
   0x3   :  { %2077 = vmatpush3.bf16.msra.mxu0 %v2374_v0  ;;  %2078 = vmatprep.mubr.msk.bf16.mxu0 %vm70_vm0, %v2375_v1  ;;  %v2378_v4 = vld [vmem:[%s3062_s3] sm:$0xff]   ;;  %v2381_v7 = vld [vmem:[%s3063_s4 + $0x38] sm:$0xff]   ;;  %v2382_v8 = vld [vmem:[%s3063_s4 + $0x68] sm:$0xff]  }
   0x4   :  { %2082 = vmatprep.subr.bf16.mxu1 %v2377_v3  ;;  %2092 = vmatprep.subr.bf16.mxu0 %v2379_v5  ;;  %v2384_v9 = vld [vmem:[%s3063_s4 + $0x60] sm:$0xff]   ;;  %v2386_v10 = vld [vmem:[%s3063_s4 + $0x58] sm:$0xff]   ;;  %v2388_v11 = vld [vmem:[%s3063_s4 + $0x50] sm:$0xff]   ;;  %v223_v30 = vadd.s32 16, %v2575_v28  ;;  %v222_v31 = vadd.s32 8, %v2575_v28  ;;  %v229_v37 = vand.u32 15, %v2575_v28 }
   0x5   :  { %2083 = vmatpush3.bf16.msra.mxu1 %v2377_v3  ;;  %v2383_v15 = vld [vmem:[%s3063_s4 + $0x30] sm:$0xff]   ;;  %v2385_v17 = vld [vmem:[%s3063_s4 + $0x28] sm:$0xff]   ;;  %v2387_v18 = vld [vmem:[%s3063_s4 + $0x20] sm:$0xff]   ;;  %vm318_vm5 = vcmp.lt.s32.totalorder %v2575_v28, 1  ;;  %vm333_vm6 = vcmp.lt.s32.totalorder %v2575_v28, 7 }
   0x6   :  { %2079 = vmatmul.mubr.msk.bf16.vlgmr.msra.gmra.mxu0 %vm70_vm0, %v2376_v2  ;;  %2084 = vmatprep.subr.bf16.mxu1 %v2378_v4  ;;  %v2389_v19 = vld [vmem:[%s3063_s4 + $0x18] sm:$0xff]   ;;  %v2390_v20 = vld [vmem:[%s3063_s4 + $0x48] sm:$0xff]   ;;  %v2391_v21 = vld [vmem:[%s3063_s4 + $0x10] sm:$0xff]   ;;  %v243_v36 = vand.u32 15, %v223_v30  ;;  %v236_v39 = vand.u32 15, %v222_v31  ;;  %vm273_vm3 = vcmp.ge.s32.totalorder %v229_v37, 1 }
   0x7   :  { %2093 = vmatpush3.bf16.msra.mxu0 %v2379_v5  ;;  %v2392_v22 = vld [vmem:[%s3063_s4 + $0x40] sm:$0xff]   ;;  %v2393_v23 = vld [vmem:[%s3063_s4 + $0x8] sm:$0xff]   ;;  %v2394_v24 = vld [vmem:[%s3063_s4 + $0xb8] sm:$0xff]   ;;  %v2597_v51 = vsel %vm273_vm3, 1.0, %v2431_v26 }
   0x8   :  { %2094 = vmatprep.subr.bf16.mxu0 %v2380_v6  ;;  %v2395_v25 = vld [vmem:[%s3063_s4] sm:$0xff]   ;;  %v1930_v32 = vld [vmem:[%s3064_s1 + $0x8] sm:$0xff]   ;;  %vm275_vm2 = vcmp.ge.s32.totalorder %v243_v36, 1  ;;  %vm286_vm4 = vcmp.le.s32.totalorder %v236_v39, 14  ;;  %v2396_v60 = vld [vmem:[%s3063_s4 + $0xb0] sm:$0xff]  }
   0x9   :  { %2085 = vmatpush3.bf16.msra.mxu1 %v2378_v4  ;;  %v1923_v29 = vld [vmem:[%s3064_s1] sm:$0xff]   ;;  %v1929_v38 = vunpack.c.h.bf16 %v1930_v32  ;;  %v1928_v43 = vunpack.c.l.bf16 %v1930_v32  ;;  %v2594_v50 = vsel %vm275_vm2, 1.0, %v2431_v26  ;;  %v2601_v55 = vsel %vm286_vm4, 1.0, %v2431_v26  ;;  %v2691_v30 = vld [vmem:[%s3065_s12 + $0x50] sm:$0xff]  ;;  %v2698_v31 = vld [vmem:[%s3065_s12 + $0x48] sm:$0xff] }
   0xa   :  { %2112 = vmatprep.subr.bf16.mxu1 %v2381_v7  ;;  %v1925_v33 = vunpack.c.h.bf16 %v1923_v29  ;;  %v1924_v34 = vunpack.c.l.bf16 %v1923_v29  ;;  %v2677_v27 = vld [vmem:[%s3065_s12 + $0x60] sm:$0xff]  ;;  %v2684_v29 = vld [vmem:[%s3065_s12 + $0x58] sm:$0xff]  ;;  %v2756_v39 = vld [vmem:[%s3065_s12 + $0x8] sm:$0xff] }
   0xb   :  { %2095 = vmatpush3.bf16.msra.mxu0 %v2380_v6  ;;  %v2705_v32 = vld [vmem:[%s3065_s12 + $0x40] sm:$0xff]  ;;  %v2738_v37 = vld [vmem:[%s3065_s12 + $0x18] sm:$0xff] }
   0xc   :  { %2096 = vmatprep.subr.bf16.mxu0 %v2382_v8  ;;  %v2733_v36 = vld [vmem:[%s3065_s12 + $0x20] sm:$0xff] }
   0xf   :  { %2097 = vmatpush3.bf16.msra.mxu0 %v2382_v8 }
  0x10   :  { %2098 = vmatprep.subr.bf16.mxu0 %v2384_v9 }
  0x13   :  { %2099 = vmatpush3.bf16.msra.mxu0 %v2384_v9 }
  0x14   :  { %2100 = vmatprep.subr.bf16.mxu0 %v2386_v10 }
  0x17   :  { %2101 = vmatpush3.bf16.msra.mxu0 %v2386_v10  ;;  %v2398_v10 = vld [vmem:[%s3063_s4 + $0xa0] sm:$0xff]  }
  0x18   :  { %2102 = vmatprep.subr.bf16.mxu0 %v2388_v11 }
  0x1b   :  { %2103 = vmatpush3.bf16.msra.mxu0 %v2388_v11  ;;  %v2399_v11 = vld [vmem:[%s3063_s4 + $0x98] sm:$0xff]  }
  0x1c   :  { %2104 = vmatprep.subr.bf16.mxu0 %v2390_v20 }
  0x1f   :  { %2105 = vmatpush3.bf16.msra.mxu0 %v2390_v20 }
  0x20   :  { %2106 = vmatprep.subr.bf16.mxu0 %v2392_v22 }
  0x23   :  { %2107 = vmatpush3.bf16.msra.mxu0 %v2392_v22 }
  0x24   :  { %2132 = vmatprep.subr.bf16.mxu0 %v2394_v24 }
  0xc6   :  { %v2080_v12 = vpop.f32.mrf.mxu0 }
  0xc8   :  { %v111_v13 = vpop.f32.mrf.mxu0 }
  0xc9   :  { %2086 = vmatprep.mubr.msk.f32.mxu1 %vm142_vm1, %v111_v13  ;;  %v2400_v13 = vld [vmem:[%s3063_s4 + $0x90] sm:$0xff]  }
  0xca   :  { %v2081_v14 = vpop.f32.mrf.mxu0 }
  0xcc   :  { %v114_v16 = vpop.f32.mrf.mxu0 }
  0xcd   :  { %2087 = vmatmul.mubr.msk.f32.vlgmr.msra.gmra.mxu1 %vm142_vm1, %v114_v16 }
  0xce   :  { %2089 = vmatprep.mubr.msk.f32.mxu1 %vm142_vm1, %v2080_v12  ;;  %2113 = vmatpush3.bf16.msra.mxu1 %v2381_v7  ;;  %v2397_v7 = vld [vmem:[%s3063_s4 + $0xa8] sm:$0xff]   ;;  %v224_v12 = vadd.s32 24, %v2575_v28 }
  0xcf   :  { %2114 = vmatprep.subr.bf16.mxu1 %v2383_v15 }
  0xd1   :  { %2090 = vmatmul.mubr.msk.f32.gmra.mxu1 %vm142_vm1, %v2081_v14  ;;  %v250_v14 = vand.u32 15, %v224_v12 }
  0xd2   :  { %2115 = vmatpush3.bf16.msra.mxu1 %v2383_v15  ;;  %v2401_v15 = vld [vmem:[%s3063_s4 + $0x88] sm:$0xff]  }
  0xd3   :  { %2116 = vmatprep.subr.bf16.mxu1 %v2385_v17  ;;  %vm288_vm7 = vcmp.le.s32.totalorder %v250_v14, 14 }
  0xd6   :  { %2117 = vmatpush3.bf16.msra.mxu1 %v2385_v17  ;;  %v2402_v17 = vld [vmem:[%s3063_s4 + $0x80] sm:$0xff]  }
  0xd7   :  { %2118 = vmatprep.subr.bf16.mxu1 %v2387_v18 }
  0xda   :  { %2119 = vmatpush3.bf16.msra.mxu1 %v2387_v18 }
  0xdb   :  { %2120 = vmatprep.subr.bf16.mxu1 %v2389_v19 }
  0xde   :  { %2121 = vmatpush3.bf16.msra.mxu1 %v2389_v19  ;;  %v2647_v19 = vsel %vm288_vm7, 1.0, %v2431_v26 }
  0xdf   :  { %2122 = vmatprep.subr.bf16.mxu1 %v2391_v21 }
  0xe2   :  { %2123 = vmatpush3.bf16.msra.mxu1 %v2391_v21 }
  0xe3   :  { %2124 = vmatprep.subr.bf16.mxu1 %v2393_v23 }
  0xe6   :  { %2125 = vmatpush3.bf16.msra.mxu1 %v2393_v23  ;;  %v2656_v23 = vld [vmem:[%s3065_s12 + $0x78] sm:$0xff] }
  0xe7   :  { %2126 = vmatprep.subr.bf16.mxu1 %v2395_v25 }
  0xea   :  { %2127 = vmatpush3.bf16.msra.mxu1 %v2395_v25  ;;  %v2670_v25 = vld [vmem:[%s3065_s12 + $0x68] sm:$0xff] }
  0xeb   :  { %2152 = vmatprep.subr.mxu1 %v2431_v26 }
 0x18d   :  { %v2088_v35 = vpop.f32.mrf.mxu1 }
 0x18e   :  { %v217_v41 = vadd.f32 %v2088_v35, %v1925_v33  ;;  %v2712_v33 = vld [vmem:[%s3065_s12 + $0x38] sm:$0xff]  ;;  %v2726_v35 = vld [vmem:[%s3065_s12 + $0x28] sm:$0xff] }
 0x18f   :  { %v189_v40 = vpop.f32.mrf.mxu1 }
 0x190   :  { %v2586_v42 = vadd.f32 %v1924_v34, %v189_v40  ;;  %v315_v52 = vrot.slane %v217_v41, 7  ;;  %v330_v53 = vrot.slane %v217_v41, 1  ;;  %v2719_v34 = vld [vmem:[%s3065_s12 + $0x30] sm:$0xff]  ;;  %v2763_v40 = vld [vmem:[%s3065_s12] sm:$0xff] }
 0x191   :  { %v2091_v44 = vpop.f32.mrf.mxu1 }
 0x192   :  { %v2588_v45 = vadd.f32 %v2091_v44, %v1929_v38  ;;  %v360_v46 = vpack.c.bf16 %v217_v41, %v2586_v42  ;;  %v314_v54 = vrot.slane %v2586_v42, 7  ;;  %v329_v56 = vrot.slane %v2586_v42, 1  ;;  %v2747_v38 = vld [vmem:[%s3065_s12 + $0x10] sm:$0xff]  ;;  %v2772_v41 = vld [vmem:[%s3066_s13] sm:$0xff] }
 0x193   :  { %v199_v47 = vpop.f32.mrf.mxu1 }
 0x194   :  { %v317_v48 = vrot.slane %v2588_v45, 7  ;;  %v218_v49 = vadd.f32 %v1928_v43, %v199_v47  ;;  %2108 = vmatprep.mubr.bf16.mxu0 %v360_v46  ;;  %v321_v2 = vsel %vm318_vm5, %v314_v54, %v315_v52  ;;  %v336_v6 = vsel %vm333_vm6, %v329_v56, %v330_v53 }
 0x195   :  { %v332_v16 = vrot.slane %v2588_v45, 1 }
 0x196   :  { %v316_v57 = vrot.slane %v218_v49, 7  ;;  %v331_v58 = vrot.slane %v218_v49, 1  ;;  %v361_v59 = vpack.c.bf16 %v2588_v45, %v218_v49  ;;  %v322_v61 = vsel %vm318_vm5, %v317_v48, %v314_v54 }
 0x197   :  { %v323_v63 = vmul.f32 %v2597_v51, %v322_v61  ;;  %v337_v18 = vsel %vm333_vm6, %v332_v16, %v329_v56 }
 0x198   :  { %v320_v62 = vsel %vm318_vm5, %v315_v52, %v316_v57  ;;  %2109 = vmatmul.mubr.bf16.vlgmr.msra.gmra.mxu0 %v361_v59  ;;  %v335_v0 = vsel %vm333_vm6, %v330_v53, %v331_v58  ;;  %v319_v4 = vsel %vm318_vm5, %v316_v57, %v317_v48  ;;  %v341_v20 = vmul.f32 %v2647_v19, %v337_v18 }
 0x199   :  { %v325_v1 = vmul.f32 %v2594_v50, %v320_v62  ;;  %2133 = vmatpush3.bf16.msra.mxu0 %v2394_v24  ;;  %v339_v3 = vmul.f32 %v2601_v55, %v335_v0  ;;  %v327_v5 = vpack.c.bf16 %v321_v2, %v323_v63  ;;  %v334_v21 = vsel %vm333_vm6, %v331_v58, %v332_v16  ;;  %v2663_v24 = vld [vmem:[%s3065_s12 + $0x70] sm:$0xff]  ;;  %v1858_v0 = vld [vmem:[%s3067_s5] ss:$0 sm:$0xff] }
 0x19a   :  { %2134 = vmatprep.subr.bf16.mxu0 %v2396_v60  ;;  %v343_v22 = vpack.c.bf16 %v341_v20, %v334_v21  ;;  %v2817_v18 = vsub.s32 0, %v2575_v28 }
 0x19b   :  { %v328_v8 = vpack.c.bf16 %v319_v4, %v325_v1  ;;  %v342_v9 = vpack.c.bf16 %v339_v3, %v336_v6  ;;  %2128 = vmatprep.mubr.bf16.mxu1 %v327_v5 }
 0x19d   :  { %2135 = vmatpush3.bf16.msra.mxu0 %v2396_v60  ;;  %2129 = vmatmul.mubr.bf16.vlgmr.msra.gmra.mxu1 %v328_v8 }
 0x19e   :  { %2148 = vmatprep.mubr.bf16.mxu0 %v342_v9  ;;  %2136 = vmatprep.subr.bf16.mxu0 %v2397_v7 }
 0x19f   :  { %2153 = vmatpush3.msra.mxu1 %v2656_v23  ;;  %2184 = vmatprep.mubr.msk.f32.mxu1 %vm2432_vm8, %v2431_v26 }
 0x1a0   :  { %2154 = vmatprep.subr.mxu1 %v2431_v26 }
 0x1a1   :  { %2137 = vmatpush3.bf16.msra.mxu0 %v2397_v7  ;;  %2155 = vmatpush3.msra.mxu1 %v2663_v24 }
 0x1a2   :  { %2138 = vmatprep.subr.bf16.mxu0 %v2398_v10  ;;  %2156 = vmatprep.subr.mxu1 %v2431_v26 }
 0x1a3   :  { %2157 = vmatpush3.msra.mxu1 %v2670_v25 }
 0x1a4   :  { %2158 = vmatprep.subr.mxu1 %v2431_v26 }
 0x1a5   :  { %2139 = vmatpush3.bf16.msra.mxu0 %v2398_v10  ;;  %2159 = vmatpush3.msra.mxu1 %v2677_v27 }
 0x1a6   :  { %2140 = vmatprep.subr.bf16.mxu0 %v2399_v11  ;;  %2160 = vmatprep.subr.mxu1 %v2431_v26 }
 0x1a7   :  { %2161 = vmatpush3.msra.mxu1 %v2684_v29 }
 0x1a8   :  { %2162 = vmatprep.subr.mxu1 %v2431_v26 }
 0x1a9   :  { %2141 = vmatpush3.bf16.msra.mxu0 %v2399_v11  ;;  %2163 = vmatpush3.msra.mxu1 %v2691_v30 }
 0x1aa   :  { %2142 = vmatprep.subr.bf16.mxu0 %v2400_v13  ;;  %2164 = vmatprep.subr.mxu1 %v2431_v26 }
 0x1ab   :  { %2165 = vmatpush3.msra.mxu1 %v2698_v31 }
 0x1ac   :  { %2166 = vmatprep.subr.mxu1 %v2431_v26 }
 0x1ad   :  { %2143 = vmatpush3.bf16.msra.mxu0 %v2400_v13  ;;  %2167 = vmatpush3.msra.mxu1 %v2705_v32 }
 0x1ae   :  { %2144 = vmatprep.subr.bf16.mxu0 %v2401_v15  ;;  %2168 = vmatprep.subr.mxu1 %v2431_v26 }
 0x1af   :  { %2169 = vmatpush3.msra.mxu1 %v2712_v33 }
 0x1b0   :  { %2170 = vmatprep.subr.mxu1 %v2431_v26 }
 0x1b1   :  { %2145 = vmatpush3.bf16.msra.mxu0 %v2401_v15  ;;  %2171 = vmatpush3.msra.mxu1 %v2719_v34 }
 0x1b2   :  { %2146 = vmatprep.subr.bf16.mxu0 %v2402_v17  ;;  %2172 = vmatprep.subr.mxu1 %v2431_v26 }
 0x1b3   :  { %2173 = vmatpush3.msra.mxu1 %v2726_v35 }
 0x1b4   :  { %2174 = vmatprep.subr.mxu1 %v2431_v26 }
 0x1b5   :  { %2147 = vmatpush3.bf16.msra.mxu0 %v2402_v17  ;;  %2175 = vmatpush3.msra.mxu1 %v2733_v36 }
 0x1b6   :  { %2187 = vmatprep.subr.mxu0 %v2431_v26  ;;  %2176 = vmatprep.subr.mxu1 %v2431_v26 }
 0x1b7   :  { %2177 = vmatpush3.msra.mxu1 %v2738_v37 }
 0x1b8   :  { %2149 = vmatmul.mubr.bf16.vlgmr.msra.gmra.mxu0 %v343_v22  ;;  %2178 = vmatprep.subr.mxu1 %v2431_v26 }
 0x1b9   :  { %2189 = vmatprep.mubr.msk.f32.mxu0 %vm2432_vm8, %v2431_v26  ;;  %2179 = vmatpush3.msra.mxu1 %v2747_v38 }
 0x1ba   :  { %2180 = vmatprep.subr.mxu1 %v2431_v26  ;;  %2188 = vmatpush3.msra.mxu0 %v2772_v41 }
 0x1bb   :  { %2181 = vmatpush3.msra.mxu1 %v2756_v39  ;;  %2227 = vmatprep.subr.mxu0 %v2431_v26 }
 0x1bc   :  { %2182 = vmatprep.subr.mxu1 %v2431_v26 }
 0x1bd   :  { %2183 = vmatpush3.msra.mxu1 %v2763_v40 }
 0x1be   :  { %2192 = vmatprep.subr.mxu1 %v2431_v26 }
 0x258   :  { %v2110_v42 = vpop.f32.mrf.mxu0 }
 0x25a   :  { %v461_v43 = vpop.f32.mrf.mxu0 }
 0x25c   :  { %v2111_v45 = vpop.f32.mrf.mxu0 }
 0x25d   :  { %v2130_v44 = vpop.f32.mrf.mxu1 }
 0x25e   :  { %v464_v47 = vpop.f32.mrf.mxu0  ;;  %v567_v57 = vadd.f32 %v2130_v44, %v2110_v42 }
 0x25f   :  { %v558_v46 = vpop.f32.mrf.mxu1 }
 0x260   :  { %v559_v54 = vadd.f32 %v558_v46, %v461_v43 }
 0x261   :  { %v2131_v48 = vpop.f32.mrf.mxu1 }
 0x262   :  { %v570_v61 = vadd.f32 %v2131_v48, %v2111_v45 }
 0x263   :  { %v561_v52 = vpop.f32.mrf.mxu1 }
 0x264   :  { %v562_v58 = vadd.f32 %v561_v52, %v464_v47 }
 0x278   :  { %v2150_v49 = vpop.f32.mrf.mxu0 }
 0x279   :  { %v689_v62 = vadd.f32 %v2150_v49, %v567_v57 }
 0x27a   :  { %v672_v53 = vpop.f32.mrf.mxu0 }
 0x27b   :  { %v687_v59 = vadd.f32 %v672_v53, %v559_v54  ;;  %v700_v4 = vadd.f32 %v1858_v0, %v689_v62  ;;  %v2403_v62 = vld [vmem:[%s3068_s8 + $0x78] sm:$0xff]  }
 0x27c   :  { %v2151_v56 = vpop.f32.mrf.mxu0 }
 0x27d   :  { %v698_v1 = vadd.f32 %v1858_v0, %v687_v59  ;;  %v690_v2 = vadd.f32 %v2151_v56, %v570_v61 }
 0x27e   :  { %v675_v60 = vpop.f32.mrf.mxu0 }
 0x27f   :  { %v688_v63 = vadd.f32 %v675_v60, %v562_v58  ;;  %v701_v6 = vadd.f32 %v1858_v0, %v690_v2  ;;  %v2411_v2 = vld [vmem:[%s3068_s8 + $0x20] sm:$0xff]  }
 0x281   :  { %v699_v3 = vadd.f32 %v1858_v0, %v688_v63  ;;  %v2405_v63 = vld [vmem:[%s3068_s8 + $0x38] sm:$0xff]   ;;  %v2407_v0 = vld [vmem:[%s3068_s8 + $0x30] sm:$0xff]  }
 0x283   :  { %v702_v5 = vadd.f32 %v699_v3, %v698_v1 }
 0x285   :  { %v703_v7 = vadd.f32 %v702_v5, %v700_v4 }
 0x287   :  { %v704_v8 = vadd.f32 %v703_v7, %v701_v6  ;;  %v948_v7 = vld [vmem:[%s3069_s6] sm:$0x1] }
 0x289   :  { %v705_v9 = vrot.slane %v704_v8, 4 }
 0x28b   :  { %v706_v10 = vadd.f32 %v705_v9, %v704_v8 }
 0x28d   :  { %v707_v11 = vrot.slane %v706_v10, 2 }
 0x28f   :  { %v708_v12 = vadd.f32 %v707_v11, %v706_v10  ;;  %v2404_v10 = vld [vmem:[%s3068_s8 + $0x70] sm:$0xff]   ;;  %v2406_v11 = vld [vmem:[%s3068_s8 + $0x68] sm:$0xff]  }
 0x291   :  { %v709_v13 = vrot.slane %v708_v12, 1 }
 0x293   :  { %v710_v14 = vadd.f32 %v709_v13, %v708_v12  ;;  %v2408_v12 = vld [vmem:[%s3068_s8 + $0x60] sm:$0xff]   ;;  %v2410_v13 = vld [vmem:[%s3068_s8 + $0x58] sm:$0xff]  }
 0x295   :  { %2185 = vmatmul.mubr.f32.vlgmr.msra.gmra.mxu1 %v710_v14  ;;  %v2412_v14 = vld [vmem:[%s3068_s8 + $0x50] sm:$0xff]  }
 0x296   :  { %2193 = vmatpush3.msra.mxu1 %v2656_v23  ;;  %2224 = vmatprep.mubr.msk.f32.mxu1 %vm2432_vm8, %v2431_v26 }
 0x297   :  { %2194 = vmatprep.subr.mxu1 %v2431_v26 }
 0x298   :  { %2195 = vmatpush3.msra.mxu1 %v2663_v24 }
 0x299   :  { %2196 = vmatprep.subr.mxu1 %v2431_v26 }
 0x29a   :  { %2197 = vmatpush3.msra.mxu1 %v2670_v25 }
 0x29b   :  { %2198 = vmatprep.subr.mxu1 %v2431_v26 }
 0x29c   :  { %2199 = vmatpush3.msra.mxu1 %v2677_v27 }
 0x29d   :  { %2200 = vmatprep.subr.mxu1 %v2431_v26 }
 0x29e   :  { %2201 = vmatpush3.msra.mxu1 %v2684_v29 }
 0x29f   :  { %2202 = vmatprep.subr.mxu1 %v2431_v26 }
 0x2a0   :  { %2203 = vmatpush3.msra.mxu1 %v2691_v30 }
 0x2a1   :  { %2204 = vmatprep.subr.mxu1 %v2431_v26 }
 0x2a2   :  { %2205 = vmatpush3.msra.mxu1 %v2698_v31 }
 0x2a3   :  { %2206 = vmatprep.subr.mxu1 %v2431_v26 }
 0x2a4   :  { %2207 = vmatpush3.msra.mxu1 %v2705_v32 }
 0x2a5   :  { %2208 = vmatprep.subr.mxu1 %v2431_v26 }
 0x2a6   :  { %2209 = vmatpush3.msra.mxu1 %v2712_v33 }
 0x2a7   :  { %2210 = vmatprep.subr.mxu1 %v2431_v26 }
 0x2a8   :  { %2211 = vmatpush3.msra.mxu1 %v2719_v34 }
 0x2a9   :  { %2212 = vmatprep.subr.mxu1 %v2431_v26 }
 0x2aa   :  { %2213 = vmatpush3.msra.mxu1 %v2726_v35 }
 0x2ab   :  { %2214 = vmatprep.subr.mxu1 %v2431_v26 }
 0x2ac   :  { %2215 = vmatpush3.msra.mxu1 %v2733_v36 }
 0x2ad   :  { %2216 = vmatprep.subr.mxu1 %v2431_v26 }
 0x2ae   :  { %2217 = vmatpush3.msra.mxu1 %v2738_v37 }
 0x2af   :  { %2218 = vmatprep.subr.mxu1 %v2431_v26 }
 0x2b0   :  { %2219 = vmatpush3.msra.mxu1 %v2747_v38 }
 0x2b1   :  { %2220 = vmatprep.subr.mxu1 %v2431_v26 }
 0x2b2   :  { %2221 = vmatpush3.msra.mxu1 %v2756_v39 }
 0x2b3   :  { %2222 = vmatprep.subr.mxu1 %v2431_v26 }
 0x2b4   :  { %2223 = vmatpush3.msra.mxu1 %v2763_v40 }
 0x2b5   :  { %2252 = vmatprep.subr.bf16.mxu1 %v2405_v63 }
 0x355   :  { %v777_v15 = vpop.f32.mrf.mxu1 }
 0x356   :  { %v781_v16 = vmul.f32 0.001953125, %v777_v15  ;;  %v2413_v15 = vld [vmem:[%s3068_s8 + $0x18] sm:$0xff]  }
 0x357   :  { %v2186_v17 = vpop.f32.mrf.mxu1 }
 0x358   :  { %2190 = vmatmul.mubr.msk.f32.vlgmr.msra.gmra.mxu0 %vm782_vm9, %v781_v16  ;;  %v2414_v16 = vld [vmem:[%s3068_s8 + $0x48] sm:$0xff]   ;;  %v2415_v17 = vld [vmem:[%s3068_s8 + $0x10] sm:$0xff]  }
 0x359   :  { %2228 = vmatpush3.msra.mxu0 %v2772_v41  ;;  %2229 = vmatprep.mubr.msk.f32.mxu0 %vm2432_vm8, %v2431_v26 }
 0x35a   :  { %2232 = vmatprep.subr.bf16.mxu0 %v2403_v62 }
 0x418   :  { %v852_v20 = vpop.f32.mrf.mxu0 }
 0x419   :  { %v859_v21 = vrot.slane %v852_v20, %v2817_v18  ;;  %v2416_v20 = vld [vmem:[%s3068_s8 + $0x40] sm:$0xff]  }
 0x41a   :  { %v2191_v22 = vpop.f32.mrf.mxu0 }
 0x41b   :  { %v2820_v42 = vsub.f32 %v698_v1, %v859_v21  ;;  %v2822_v43 = vsub.f32 %v699_v3, %v859_v21  ;;  %v2824_v44 = vsub.f32 %v700_v4, %v859_v21  ;;  %v2826_v45 = vsub.f32 %v701_v6, %v859_v21  ;;  %v2409_v1 = vld [vmem:[%s3068_s8 + $0x28] sm:$0xff]   ;;  %v2418_v22 = vld [vmem:[%s3068_s8 + $0xb8] sm:$0xff]  }
 0x41c   :  { %v2417_v21 = vld [vmem:[%s3068_s8 + $0x8] sm:$0xff]  }
 0x41d   :  { %v864_v46 = vmul.f32 %v2820_v42, %v2820_v42  ;;  %v865_v47 = vmul.f32 %v2822_v43, %v2822_v43  ;;  %v866_v48 = vmul.f32 %v2824_v44, %v2824_v44  ;;  %v867_v52 = vmul.f32 %v2826_v45, %v2826_v45 }
 0x41f   :  { %v868_v49 = vadd.f32 %v865_v47, %v864_v46  ;;  %v2419_v46 = vld [vmem:[%s3068_s8] sm:$0xff]  }
 0x421   :  { %v869_v53 = vadd.f32 %v868_v49, %v866_v48  ;;  %v1861_v49 = vld [vmem:[%s3070_s7] ss:$0 sm:$0xff] }
 0x423   :  { %v870_v54 = vadd.f32 %v869_v53, %v867_v52 }
 0x425   :  { %v871_v56 = vrot.slane %v870_v54, 4 }
 0x427   :  { %v872_v57 = vadd.f32 %v871_v56, %v870_v54 }
 0x429   :  { %v873_v58 = vrot.slane %v872_v57, 2 }
 0x42b   :  { %v874_v59 = vadd.f32 %v873_v58, %v872_v57 }
 0x42d   :  { %v875_v60 = vrot.slane %v874_v59, 1 }
 0x42f   :  { %v876_v61 = vadd.f32 %v875_v60, %v874_v59 }
 0x431   :  { %2225 = vmatmul.mubr.f32.vlgmr.msra.gmra.mxu1 %v876_v61 }
 0x432   :  { %2253 = vmatpush3.bf16.msra.mxu1 %v2405_v63 }
 0x433   :  { %2254 = vmatprep.subr.bf16.mxu1 %v2407_v0 }
 0x436   :  { %2255 = vmatpush3.bf16.msra.mxu1 %v2407_v0 }
 0x437   :  { %2256 = vmatprep.subr.bf16.mxu1 %v2409_v1 }
 0x43a   :  { %2257 = vmatpush3.bf16.msra.mxu1 %v2409_v1 }
 0x43b   :  { %2258 = vmatprep.subr.bf16.mxu1 %v2411_v2 }
 0x43e   :  { %2259 = vmatpush3.bf16.msra.mxu1 %v2411_v2 }
 0x43f   :  { %2260 = vmatprep.subr.bf16.mxu1 %v2413_v15 }
 0x442   :  { %2261 = vmatpush3.bf16.msra.mxu1 %v2413_v15 }
 0x443   :  { %2262 = vmatprep.subr.bf16.mxu1 %v2415_v17 }
 0x446   :  { %2263 = vmatpush3.bf16.msra.mxu1 %v2415_v17 }
 0x447   :  { %2264 = vmatprep.subr.bf16.mxu1 %v2417_v21 }
 0x44a   :  { %2265 = vmatpush3.bf16.msra.mxu1 %v2417_v21  ;;  %v2422_v21 = vld [vmem:[%s3068_s8 + $0xa0] sm:$0xff]  }
 0x44b   :  { %2266 = vmatprep.subr.bf16.mxu1 %v2419_v46 }
 0x44e   :  { %2267 = vmatpush3.bf16.msra.mxu1 %v2419_v46  ;;  %v2425_v46 = vld [vmem:[%s3068_s8 + $0x88] sm:$0xff]  }
 0x44f   :  { %2292 = vmatprep.subr.mxu1 %v2431_v26 }
 0x4f1   :  { %v943_v3 = vpop.f32.mrf.mxu1 }
 0x4f2   :  { %v947_v4 = vmul.f32 0.001953125, %v943_v3 }
 0x4f3   :  { %v2226_v5 = vpop.f32.mrf.mxu1 }
 0x4f4   :  { %v949_v6 = vadd.f32 1e-05, %v947_v4 }
 0x4f6   :  { %2427 = vrsqrt.f32 %v949_v6 }
 0x503   :  { %v2428_v8 = vpop.eup %2427 }
 0x504   :  { %v951_v9 = vmul.f32 %v2428_v8, %v948_v7 }
 0x506   :  { %2230 = vmatmul.mubr.msk.f32.vlgmr.msra.gmra.mxu0 %vm782_vm9, %v951_v9 }
 0x507   :  { %2233 = vmatpush3.bf16.msra.mxu0 %v2403_v62 }
 0x508   :  { %2234 = vmatprep.subr.bf16.mxu0 %v2404_v10 }
 0x50b   :  { %2235 = vmatpush3.bf16.msra.mxu0 %v2404_v10 }
 0x50c   :  { %2236 = vmatprep.subr.bf16.mxu0 %v2406_v11 }
 0x50f   :  { %2237 = vmatpush3.bf16.msra.mxu0 %v2406_v11 }
 0x510   :  { %2238 = vmatprep.subr.bf16.mxu0 %v2408_v12 }
 0x513   :  { %2239 = vmatpush3.bf16.msra.mxu0 %v2408_v12 }
 0x514   :  { %2240 = vmatprep.subr.bf16.mxu0 %v2410_v13 }
 0x517   :  { %2241 = vmatpush3.bf16.msra.mxu0 %v2410_v13 }
 0x518   :  { %2242 = vmatprep.subr.bf16.mxu0 %v2412_v14 }
 0x51b   :  { %2243 = vmatpush3.bf16.msra.mxu0 %v2412_v14 }
 0x51c   :  { %2244 = vmatprep.subr.bf16.mxu0 %v2414_v16 }
 0x51f   :  { %2245 = vmatpush3.bf16.msra.mxu0 %v2414_v16 }
 0x520   :  { %2246 = vmatprep.subr.bf16.mxu0 %v2416_v20 }
 0x523   :  { %2247 = vmatpush3.bf16.msra.mxu0 %v2416_v20 }
 0x524   :  { %2272 = vmatprep.subr.bf16.mxu0 %v2418_v22 }
 0x5c6   :  { %v1021_v47 = vpop.f32.mrf.mxu0 }
 0x5c7   :  { %v1028_v48 = vrot.slane %v1021_v47, %v2817_v18 }
 0x5c8   :  { %v2231_v52 = vpop.f32.mrf.mxu0 }
 0x5c9   :  { %v1029_v53 = vmul.f32 %v1028_v48, %v2820_v42  ;;  %v1030_v54 = vmul.f32 %v1028_v48, %v2822_v43  ;;  %v1031_v56 = vmul.f32 %v1028_v48, %v2824_v44  ;;  %v1032_v57 = vmul.f32 %v1028_v48, %v2826_v45  ;;  %v2420_v45 = vld [vmem:[%s3068_s8 + $0xb0] sm:$0xff]   ;;  %v2426_v48 = vld [vmem:[%s3068_s8 + $0x80] sm:$0xff]  }
 0x5cb   :  { %v1042_v58 = vadd.f32 %v1861_v49, %v1031_v56  ;;  %v1043_v59 = vadd.f32 %v1861_v49, %v1032_v57  ;;  %v1040_v60 = vadd.f32 %v1861_v49, %v1029_v53  ;;  %v1041_v61 = vadd.f32 %v1861_v49, %v1030_v54 }
 0x5cd   :  { %v2900_v62 = vmax.f32 %v1042_v58, 0.0  ;;  %v2902_v63 = vmax.f32 %v1043_v59, 0.0  ;;  %v2904_v0 = vmax.f32 %v1040_v60, 0.0  ;;  %v1045_v1 = vmax.f32 %v1041_v61, 0.0 }
 0x5cf   :  { %v1092_v2 = vpack.c.bf16 %v1045_v1, %v2904_v0  ;;  %v1093_v42 = vpack.c.bf16 %v2902_v63, %v2900_v62  ;;  %v1048_v43 = vrot.slane %v2904_v0, 7  ;;  %v1049_v44 = vrot.slane %v1045_v1, 7 }
 0x5d0   :  { %v1051_v3 = vrot.slane %v2902_v63, 7  ;;  %v1062_v4 = vrot.slane %v2904_v0, 1  ;;  %v1063_v5 = vrot.slane %v1045_v1, 1  ;;  %v1064_v6 = vrot.slane %v2900_v62, 1 }
 0x5d1   :  { %2248 = vmatprep.mubr.bf16.mxu0 %v1092_v2  ;;  %v1050_v7 = vrot.slane %v2900_v62, 7  ;;  %v1054_v13 = vsel %vm318_vm5, %v1048_v43, %v1049_v44  ;;  %v1065_v47 = vrot.slane %v2902_v63, 1 }
 0x5d2   :  { %2249 = vmatmul.mubr.bf16.vlgmr.msra.gmra.mxu0 %v1093_v42  ;;  %v1055_v8 = vsel %vm318_vm5, %v1051_v3, %v1048_v43  ;;  %v1067_v9 = vsel %vm333_vm6, %v1063_v5, %v1064_v6  ;;  %v1068_v14 = vsel %vm333_vm6, %v1062_v4, %v1063_v5 }
 0x5d3   :  { %2273 = vmatpush3.bf16.msra.mxu0 %v2418_v22  ;;  %v1056_v10 = vmul.f32 %v2597_v51, %v1055_v8  ;;  %v1071_v11 = vmul.f32 %v2601_v55, %v1067_v9  ;;  %v1053_v12 = vsel %vm318_vm5, %v1049_v44, %v1050_v7  ;;  %v1052_v20 = vsel %vm318_vm5, %v1050_v7, %v1051_v3  ;;  %v2421_v51 = vld [vmem:[%s3068_s8 + $0xa8] sm:$0xff]   ;;  %v2424_v22 = vld [vmem:[%s3068_s8 + $0x90] sm:$0xff]  }
 0x5d4   :  { %2274 = vmatprep.subr.bf16.mxu0 %v2420_v45  ;;  %v1058_v15 = vmul.f32 %v2594_v50, %v1053_v12  ;;  %v2423_v50 = vld [vmem:[%s3068_s8 + $0x98] sm:$0xff]   ;;  %v1069_v49 = vsel %vm333_vm6, %v1065_v47, %v1062_v4  ;;  %v1066_v53 = vsel %vm333_vm6, %v1064_v6, %v1065_v47 }
 0x5d5   :  { %v1060_v16 = vpack.c.bf16 %v1054_v13, %v1056_v10  ;;  %v1074_v17 = vpack.c.bf16 %v1071_v11, %v1068_v14  ;;  %v1073_v52 = vmul.f32 %v2647_v19, %v1069_v49 }
 0x5d6   :  { %v1061_v55 = vpack.c.bf16 %v1052_v20, %v1058_v15 }
 0x5d7   :  { %2268 = vmatprep.mubr.bf16.mxu1 %v1060_v16  ;;  %2275 = vmatpush3.bf16.msra.mxu0 %v2420_v45  ;;  %v1075_v54 = vpack.c.bf16 %v1073_v52, %v1066_v53  ;;  %v1679_v53 = vld [vmem:[%s3072_s10] sm:$0x1] }
 0x5d8   :  { %2288 = vmatprep.mubr.bf16.mxu0 %v1074_v17  ;;  %2269 = vmatmul.mubr.bf16.vlgmr.msra.gmra.mxu1 %v1061_v55 }
 0x5d9   :  { %2276 = vmatprep.subr.bf16.mxu0 %v2421_v51  ;;  %2293 = vmatpush3.msra.mxu1 %v2656_v23 }
 0x5da   :  { %2294 = vmatprep.subr.mxu1 %v2431_v26  ;;  %2324 = vmatprep.mubr.msk.f32.mxu1 %vm2432_vm8, %v2431_v26 }
 0x5db   :  { %2277 = vmatpush3.bf16.msra.mxu0 %v2421_v51  ;;  %2295 = vmatpush3.msra.mxu1 %v2663_v24 }
 0x5dc   :  { %2278 = vmatprep.subr.bf16.mxu0 %v2422_v21  ;;  %2296 = vmatprep.subr.mxu1 %v2431_v26 }
 0x5dd   :  { %2297 = vmatpush3.msra.mxu1 %v2670_v25 }
 0x5de   :  { %2298 = vmatprep.subr.mxu1 %v2431_v26 }
 0x5df   :  { %2279 = vmatpush3.bf16.msra.mxu0 %v2422_v21  ;;  %2299 = vmatpush3.msra.mxu1 %v2677_v27 }
 0x5e0   :  { %2280 = vmatprep.subr.bf16.mxu0 %v2423_v50  ;;  %2300 = vmatprep.subr.mxu1 %v2431_v26 }
 0x5e1   :  { %2301 = vmatpush3.msra.mxu1 %v2684_v29 }
 0x5e2   :  { %2302 = vmatprep.subr.mxu1 %v2431_v26 }
 0x5e3   :  { %2281 = vmatpush3.bf16.msra.mxu0 %v2423_v50  ;;  %2303 = vmatpush3.msra.mxu1 %v2691_v30 }
 0x5e4   :  { %2282 = vmatprep.subr.bf16.mxu0 %v2424_v22  ;;  %2304 = vmatprep.subr.mxu1 %v2431_v26 }
 0x5e5   :  { %2305 = vmatpush3.msra.mxu1 %v2698_v31 }
 0x5e6   :  { %2306 = vmatprep.subr.mxu1 %v2431_v26 }
 0x5e7   :  { %2283 = vmatpush3.bf16.msra.mxu0 %v2424_v22  ;;  %2307 = vmatpush3.msra.mxu1 %v2705_v32 }
 0x5e8   :  { %2284 = vmatprep.subr.bf16.mxu0 %v2425_v46  ;;  %2308 = vmatprep.subr.mxu1 %v2431_v26 }
 0x5e9   :  { %2309 = vmatpush3.msra.mxu1 %v2712_v33 }
 0x5ea   :  { %2310 = vmatprep.subr.mxu1 %v2431_v26 }
 0x5eb   :  { %2285 = vmatpush3.bf16.msra.mxu0 %v2425_v46  ;;  %2311 = vmatpush3.msra.mxu1 %v2719_v34 }
 0x5ec   :  { %2286 = vmatprep.subr.bf16.mxu0 %v2426_v48  ;;  %2312 = vmatprep.subr.mxu1 %v2431_v26 }
 0x5ed   :  { %2313 = vmatpush3.msra.mxu1 %v2726_v35 }
 0x5ee   :  { %2314 = vmatprep.subr.mxu1 %v2431_v26 }
 0x5ef   :  { %2287 = vmatpush3.bf16.msra.mxu0 %v2426_v48  ;;  %2315 = vmatpush3.msra.mxu1 %v2733_v36 }
 0x5f0   :  { %2316 = vmatprep.subr.mxu1 %v2431_v26  ;;  %2332 = vmatprep.subr.mxu0 %v2431_v26 }
 0x5f1   :  { %2317 = vmatpush3.msra.mxu1 %v2738_v37 }
 0x5f2   :  { %2289 = vmatmul.mubr.bf16.vlgmr.msra.gmra.mxu0 %v1075_v54  ;;  %2318 = vmatprep.subr.mxu1 %v2431_v26 }
 0x5f3   :  { %2319 = vmatpush3.msra.mxu1 %v2747_v38  ;;  %2333 = vmatpush3.msra.mxu0 %v2656_v23 }
 0x5f4   :  { %2320 = vmatprep.subr.mxu1 %v2431_v26  ;;  %2334 = vmatprep.subr.mxu0 %v2431_v26 }
 0x5f5   :  { %2321 = vmatpush3.msra.mxu1 %v2756_v39  ;;  %2335 = vmatpush3.msra.mxu0 %v2663_v24 }
 0x5f6   :  { %2322 = vmatprep.subr.mxu1 %v2431_v26  ;;  %2336 = vmatprep.subr.mxu0 %v2431_v26 }
 0x5f7   :  { %2323 = vmatpush3.msra.mxu1 %v2763_v40  ;;  %2337 = vmatpush3.msra.mxu0 %v2670_v25 }
 0x5f8   :  { %2327 = vmatprep.subr.mxu1 %v2431_v26  ;;  %2338 = vmatprep.subr.mxu0 %v2431_v26 }
 0x5f9   :  { %2339 = vmatpush3.msra.mxu0 %v2677_v27  ;;  %2364 = vmatprep.mubr.msk.f32.mxu0 %vm2432_vm8, %v2431_v26 }
 0x5fa   :  { %2340 = vmatprep.subr.mxu0 %v2431_v26 }
 0x5fb   :  { %2341 = vmatpush3.msra.mxu0 %v2684_v29 }
 0x5fc   :  { %2342 = vmatprep.subr.mxu0 %v2431_v26 }
 0x5fd   :  { %2343 = vmatpush3.msra.mxu0 %v2691_v30 }
 0x5fe   :  { %2344 = vmatprep.subr.mxu0 %v2431_v26 }
 0x5ff   :  { %2345 = vmatpush3.msra.mxu0 %v2698_v31 }
 0x600   :  { %2346 = vmatprep.subr.mxu0 %v2431_v26 }
 0x601   :  { %2347 = vmatpush3.msra.mxu0 %v2705_v32 }
 0x602   :  { %2348 = vmatprep.subr.mxu0 %v2431_v26 }
 0x603   :  { %2349 = vmatpush3.msra.mxu0 %v2712_v33 }
 0x604   :  { %2350 = vmatprep.subr.mxu0 %v2431_v26 }
 0x605   :  { %2351 = vmatpush3.msra.mxu0 %v2719_v34 }
 0x606   :  { %2352 = vmatprep.subr.mxu0 %v2431_v26 }
 0x607   :  { %2353 = vmatpush3.msra.mxu0 %v2726_v35 }
 0x608   :  { %2354 = vmatprep.subr.mxu0 %v2431_v26 }
 0x609   :  { %2355 = vmatpush3.msra.mxu0 %v2733_v36 }
 0x60a   :  { %2356 = vmatprep.subr.mxu0 %v2431_v26 }
 0x60b   :  { %2357 = vmatpush3.msra.mxu0 %v2738_v37 }
 0x60c   :  { %2358 = vmatprep.subr.mxu0 %v2431_v26 }
 0x60d   :  { %2359 = vmatpush3.msra.mxu0 %v2747_v38 }
 0x60e   :  { %2360 = vmatprep.subr.mxu0 %v2431_v26 }
 0x60f   :  { %2361 = vmatpush3.msra.mxu0 %v2756_v39 }
 0x610   :  { %2362 = vmatprep.subr.mxu0 %v2431_v26 }
 0x611   :  { %2363 = vmatpush3.msra.mxu0 %v2763_v40  ;;  %v1918_v40 = vld [vmem:[%s3071_s9] ss:$0 sm:$0xff] }
 0x692   :  { %v2250_v28 = vpop.f32.mrf.mxu0 }
 0x694   :  { %v1193_v19 = vpop.f32.mrf.mxu0 }
 0x696   :  { %v2251_v24 = vpop.f32.mrf.mxu0 }
 0x698   :  { %v2270_v23 = vpop.f32.mrf.mxu1  ;;  %v1196_v27 = vpop.f32.mrf.mxu0 }
 0x699   :  { %v1299_v35 = vadd.f32 %v2270_v23, %v2250_v28 }
 0x69a   :  { %v1290_v25 = vpop.f32.mrf.mxu1 }
 0x69b   :  { %v1291_v33 = vadd.f32 %v1290_v25, %v1193_v19 }
 0x69c   :  { %v2271_v29 = vpop.f32.mrf.mxu1 }
 0x69d   :  { %v1302_v39 = vadd.f32 %v2271_v29, %v2251_v24  ;;  %v1921_v24 = vld [vmem:[%s3073_s11] ss:$0 sm:$0xff] }
 0x69e   :  { %v1293_v31 = vpop.f32.mrf.mxu1 }
 0x69f   :  { %v1294_v36 = vadd.f32 %v1293_v31, %v1196_v27 }
 0x6b2   :  { %v2290_v30 = vpop.f32.mrf.mxu0 }
 0x6b3   :  { %v1421_v56 = vadd.f32 %v2290_v30, %v1299_v35 }
 0x6b4   :  { %v1404_v32 = vpop.f32.mrf.mxu0 }
 0x6b5   :  { %v1419_v37 = vadd.f32 %v1404_v32, %v1291_v33  ;;  %v1432_v61 = vadd.f32 %v1918_v40, %v1421_v56 }
 0x6b6   :  { %v2291_v34 = vpop.f32.mrf.mxu0 }
 0x6b7   :  { %v1430_v58 = vadd.f32 %v1918_v40, %v1419_v37  ;;  %v1422_v59 = vadd.f32 %v2291_v34, %v1302_v39 }
 0x6b8   :  { %v1407_v38 = vpop.f32.mrf.mxu0 }
 0x6b9   :  { %v1420_v57 = vadd.f32 %v1407_v38, %v1294_v36  ;;  %v1433_v63 = vadd.f32 %v1918_v40, %v1422_v59 }
 0x6bb   :  { %v1431_v60 = vadd.f32 %v1918_v40, %v1420_v57 }
 0x6bd   :  { %v1434_v62 = vadd.f32 %v1431_v60, %v1430_v58 }
 0x6bf   :  { %v1435_v0 = vadd.f32 %v1434_v62, %v1432_v61 }
 0x6c1   :  { %v1436_v1 = vadd.f32 %v1435_v0, %v1433_v63 }
 0x6c3   :  { %v1437_v2 = vrot.slane %v1436_v1, 4 }
 0x6c5   :  { %v1438_v42 = vadd.f32 %v1437_v2, %v1436_v1 }
 0x6c7   :  { %v1439_v43 = vrot.slane %v1438_v42, 2 }
 0x6c9   :  { %v1440_v44 = vadd.f32 %v1439_v43, %v1438_v42 }
 0x6cb   :  { %v1441_v45 = vrot.slane %v1440_v44, 1 }
 0x6cd   :  { %v1442_v3 = vadd.f32 %v1441_v45, %v1440_v44 }
 0x6cf   :  { %2325 = vmatmul.mubr.f32.vlgmr.msra.gmra.mxu1 %v1442_v3 }
 0x6d0   :  { %2328 = vmatpush3.msra.mxu1 %v2772_v41  ;;  %2329 = vmatprep.mubr.msk.f32.mxu1 %vm2432_vm8, %v2431_v26 }
 0x6d1   :  { %2367 = vmatprep.subr.mxu1 %v2431_v26 }
 0x78f   :  { %v1509_v4 = vpop.f32.mrf.mxu1 }
 0x790   :  { %v1513_v5 = vmul.f32 0.001953125, %v1509_v4 }
 0x791   :  { %v2326_v6 = vpop.f32.mrf.mxu1 }
 0x792   :  { %2330 = vmatmul.mubr.msk.f32.vlgmr.msra.gmra.mxu1 %vm782_vm9, %v1513_v5 }
 0x793   :  { %2368 = vmatpush3.msra.mxu1 %v2772_v41  ;;  %2369 = vmatprep.mubr.msk.f32.mxu1 %vm2432_vm8, %v2431_v26 }
 0x852   :  { %v1583_v7 = vpop.f32.mrf.mxu1 }
 0x853   :  { %v1590_v8 = vrot.slane %v1583_v7, %v2817_v18 }
 0x854   :  { %v2331_v9 = vpop.f32.mrf.mxu1 }
 0x855   :  { %v1591_v10 = vsub.f32 %v1430_v58, %v1590_v8  ;;  %v1592_v11 = vsub.f32 %v1431_v60, %v1590_v8  ;;  %v1593_v12 = vsub.f32 %v1432_v61, %v1590_v8  ;;  %v1594_v13 = vsub.f32 %v1433_v63, %v1590_v8 }
 0x857   :  { %v1595_v14 = vmul.f32 %v1591_v10, %v1591_v10  ;;  %v1596_v15 = vmul.f32 %v1592_v11, %v1592_v11  ;;  %v1597_v16 = vmul.f32 %v1593_v12, %v1593_v12  ;;  %v1598_v20 = vmul.f32 %v1594_v13, %v1594_v13 }
 0x859   :  { %v1599_v17 = vadd.f32 %v1596_v15, %v1595_v14 }
 0x85b   :  { %v1600_v51 = vadd.f32 %v1599_v17, %v1597_v16 }
 0x85d   :  { %v1601_v55 = vadd.f32 %v1600_v51, %v1598_v20 }
 0x85f   :  { %v1602_v21 = vrot.slane %v1601_v55, 4 }
 0x861   :  { %v1603_v41 = vadd.f32 %v1602_v21, %v1601_v55 }
 0x863   :  { %v1604_v50 = vrot.slane %v1603_v41, 2 }
 0x865   :  { %v1605_v22 = vadd.f32 %v1604_v50, %v1603_v41 }
 0x867   :  { %v1606_v26 = vrot.slane %v1605_v22, 1 }
 0x869   :  { %v1607_v46 = vadd.f32 %v1606_v26, %v1605_v22 }
 0x86b   :  { %2365 = vmatmul.mubr.f32.vlgmr.msra.gmra.mxu0 %v1607_v46 }
 0x92b   :  { %v1674_v47 = vpop.f32.mrf.mxu0 }
 0x92c   :  { %v1678_v48 = vmul.f32 0.001953125, %v1674_v47 }
 0x92d   :  { %v2366_v49 = vpop.f32.mrf.mxu0 }
 0x92e   :  { %v1680_v52 = vadd.f32 1e-05, %v1678_v48 }
 0x930   :  { %2429 = vrsqrt.f32 %v1680_v52 }
 0x93d   :  { %v2430_v54 = vpop.eup %2429 }
 0x93e   :  { %v1682_v28 = vmul.f32 %v2430_v54, %v1679_v53 }
 0x940   :  { %2370 = vmatmul.mubr.msk.f32.vlgmr.msra.gmra.mxu1 %vm782_vm9, %v1682_v28 }
 0xa00   :  { %v1752_v19 = vpop.f32.mrf.mxu1 }
 0xa01   :  { %v1759_v23 = vrot.slane %v1752_v19, %v2817_v18 }
 0xa02   :  { %v2371_v25 = vpop.f32.mrf.mxu1 }
 0xa03   :  { %v1760_v27 = vmul.f32 %v1759_v23, %v1591_v10  ;;  %v1761_v29 = vmul.f32 %v1759_v23, %v1592_v11  ;;  %v1762_v30 = vmul.f32 %v1759_v23, %v1593_v12  ;;  %v1763_v31 = vmul.f32 %v1759_v23, %v1594_v13 }
 0xa05   :  { %v1771_v32 = vadd.f32 %v1921_v24, %v1760_v27  ;;  %v1772_v33 = vadd.f32 %v1921_v24, %v1761_v29  ;;  %v1773_v34 = vadd.f32 %v1921_v24, %v1762_v30  ;;  %v1774_v35 = vadd.f32 %v1921_v24, %v1763_v31 }
 0xa07   :  { %v1775_v36 = vmax.f32 %v1771_v32, 0.0  ;;  %v1776_v37 = vmax.f32 %v1772_v33, 0.0  ;;  %v1777_v38 = vmax.f32 %v1773_v34, 0.0  ;;  %v1778_v39 = vmax.f32 %v1774_v35, 0.0 }
 0xa09   :  { %1779 = vst [vmem:[%s3074_s14] sm:$0xff] %v1775_v36  ;;  %1780 = vst [vmem:[%s3074_s14 + $0x8] sm:$0xff] %v1776_v37 }
 0xa0a   :  { %1781 = vst [vmem:[%s3074_s14 + $0x10] sm:$0xff] %v1777_v38  ;;  %1782 = vst [vmem:[%s3074_s14 + $0x18] sm:$0xff] %v1778_v39 }

</bundles_post_ra>
